<compile_context>
chip_gen: v7x
topology: tpu7x:2x2x1
jax: 0.10.0
libtpu: 0.0.40
codegen_flags: <defaults>
</compile_context>

<pallas_src>
import jax
import jax.numpy as jnp
from jax.experimental import pallas as pl
from jax.experimental.pallas import tpu as pltpu


# ----------------------------------------------------------------------------
# Shared attention math (runs on the tiny (Bt, F, C) pooled tensors, all f32).
# ----------------------------------------------------------------------------
def _attention_scale(sum_fc, max_fc, wt1t, wt2t, wc1t, wc2t, inv_t, inv_c):
    """sum_fc / max_fc: (Bt, F, C) f32 pooled-over-S stats of x.
    Returns the combined scale ta[:, :, None] * ca[:, None, :], shape (Bt, F, C), f32."""
    Bt = sum_fc.shape[0]

    # ---- Time attention: pool over (C, S) ----
    avg_t = jnp.sum(sum_fc, axis=2) * inv_t           # (Bt, F)
    max_t = jnp.max(max_fc, axis=2)                   # (Bt, F)
    vt = jnp.concatenate([avg_t, max_t], axis=0)      # (2Bt, F): one MXU push per MLP layer
    ht = jnp.maximum(jnp.dot(vt, wt1t, preferred_element_type=jnp.float32), 0.0)
    yt = jnp.dot(ht, wt2t, preferred_element_type=jnp.float32)
    ta = jax.nn.sigmoid(yt[:Bt] + yt[Bt:])            # (Bt, F)

    # ---- Channel attention on out1 = ta * x, without materializing out1 ----
    # Exact because ta = sigmoid(.) > 0, so scaling commutes with max.
    avg_c = jnp.sum(ta[:, :, None] * sum_fc, axis=1) * inv_c   # (Bt, C)
    max_c = jnp.max(ta[:, :, None] * max_fc, axis=1)           # (Bt, C)
    vc = jnp.concatenate([avg_c, max_c], axis=0)               # (2Bt, C)
    hc = jnp.maximum(jnp.dot(vc, wc1t, preferred_element_type=jnp.float32), 0.0)
    yc = jnp.dot(hc, wc2t, preferred_element_type=jnp.float32)
    ca = jax.nn.sigmoid(yc[:Bt] + yc[Bt:])            # (Bt, C)

    return ta[:, :, None] * ca[:, None, :]            # (Bt, F, C)


# ----------------------------------------------------------------------------
# Single-pass kernel: whole (F, C, S) volume of a batch tile resident in VMEM.
# ----------------------------------------------------------------------------
def _make_single_pass_kernel(C, S, folded):
    def kernel(x_ref, wt1t_ref, wt2t_ref, wc1t_ref, wc2t_ref, o_ref):
        x = x_ref[...]                                # (Bt, F, C, S) or (Bt, F, C*S)
        Bt, F_ = x.shape[0], x.shape[1]
        x4 = x.reshape(Bt, F_, C, S) if folded else x

        # Pooled stats in f32 WITHOUT a materialized full-block f32 copy of x.
        sum_fc = jnp.sum(x4, axis=3, dtype=jnp.float32)    # (Bt, F, C)
        max_fc = jnp.max(x4, axis=3).astype(jnp.float32)   # (Bt, F, C)

        scale = _attention_scale(
            sum_fc, max_fc, wt1t_ref[...], wt2t_ref[...], wc1t_ref[...], wc2t_ref[...],
            1.0 / float(C * S), 1.0 / float(F_ * S)).astype(x.dtype)

        # Single fused elementwise pass: combined scale + ReLU.
        out4 = jnp.maximum(scale[:, :, :, None] * x4, jnp.zeros((), x.dtype))
        out = out4.reshape(x.shape) if folded else out4
        o_ref[...] = out.astype(o_ref.dtype)

    return kernel


# ----------------------------------------------------------------------------
# Two-pass S-tiled fallback (large per-batch shapes that exceed the VMEM budget).
# ----------------------------------------------------------------------------
def _make_reduce_kernel(C, S_total, F_total):
    def kernel(x_ref, wt1t_ref, wt2t_ref, wc1t_ref, wc2t_ref, scale_ref, sum_sc, max_sc):
        s = pl.program_id(1)

        @pl.when(s == 0)
        def _():
            sum_sc[...] = jnp.zeros(sum_sc.shape, sum_sc.dtype)
            max_sc[...] = jnp.full(max_sc.shape, -jnp.inf, max_sc.dtype)

        x = x_ref[...]                                # (Bt, F, C, s_tile)
        sum_sc[...] = sum_sc[...] + jnp.sum(x, axis=3, dtype=jnp.float32)
        max_sc[...] = jnp.maximum(max_sc[...], jnp.max(x, axis=3).astype(jnp.float32))

        @pl.when(s == pl.num_programs(1) - 1)
        def _():
            scale_ref[...] = _attention_scale(
                sum_sc[...], max_sc[...], wt1t_ref[...], wt2t_ref[...],
                wc1t_ref[...], wc2t_ref[...],
                1.0 / float(C * S_total), 1.0 / float(F_total * S_total))

    return kernel


def _apply_kernel(scale_ref, x_ref, o_ref):
    x = x_ref[...]                                    # (Bt, F, C, s_tile)
    scale = scale_ref[...].astype(x.dtype)            # (Bt, F, C)
    o_ref[...] = jnp.maximum(scale[:, :, :, None] * x,
                             jnp.zeros((), x.dtype)).astype(o_ref.dtype)


# ----------------------------------------------------------------------------
# Generation-aware tiling helpers.
# ----------------------------------------------------------------------------
def _device_info():
    vmem_cap = 64 << 20          # conservative default (v7x per-TC VMEM)
    try:
        vmem_cap = int(getattr(pltpu.get_tpu_info(), "vmem_capacity_bytes", vmem_cap))
    except Exception:
        pass
    prefer_even_steps = False    # v7x: 2 TensorCores split the "parallel" batch axis
    try:
        prefer_even_steps = "v7" in jax.devices()[0].device_kind.lower()
    except Exception:
        pass
    return vmem_cap, prefer_even_steps


def _pick_b_tile(B, per_batch_bytes, target_bytes, prefer_even_steps):
    fits = [d for d in range(1, B + 1) if B % d == 0 and d * per_batch_bytes <= target_bytes]
    if not fits:
        return 1
    if prefer_even_steps:
        even = [d for d in fits if (B // d) % 2 == 0]
        if even:
            return max(even)   # keep both v7x cores busy (no odd tail step)
    return max(fits)


def _pick_s_tile(S, row_bytes, target_bytes):
    divs = [d for d in range(1, S + 1) if S % d == 0]
    fits = [d for d in divs if d * row_bytes <= target_bytes]
    lane = [d for d in fits if d % 128 == 0]
    if lane:
        return max(lane)       # lane-dense tiles preferred
    if fits:
        return max(fits)
    lane_all = [d for d in divs if d % 128 == 0]
    return min(lane_all) if lane_all else S


# ----------------------------------------------------------------------------
# Wrapper.
# ----------------------------------------------------------------------------
def tca_pallas(x, wt1, wt2, wc1, wc2, *, force_two_pass=False, force_s_tile=None):
    """x: (B, F, C, H, W); wt1:(Ht,F) wt2:(F,Ht) wc1:(Hc,C) wc2:(C,Hc)
    (torch Conv*d(out,in,1) weight layout, bias=False)."""
    B, F_, C_, H, W = x.shape
    S = H * W
    Ht, Hc = wt1.shape[0], wc1.shape[0]
    wt1t, wt2t, wc1t, wc2t = wt1.T, wt2.T, wc1.T, wc2.T
    itemsize = x.dtype.itemsize

    vmem_cap, prefer_even_steps = _device_info()
    vmem_cap_limit = (vmem_cap * 3) // 4                       # headroom under physical VMEM
    target_block = int(min(8 << 20, max(2 << 20, vmem_cap_limit // 8)))

    per_batch_bytes = F_ * C_ * S * itemsize
    b_tile = _pick_b_tile(B, per_batch_bytes, target_block, prefer_even_steps)
    block_bytes = b_tile * per_batch_bytes
    # 2x input + 2x output double-buffers + ~1 block of fused temporaries, plus slack.
    single_pass_vmem = 5 * block_bytes + (2 << 20)
    use_two_pass = force_two_pass or single_pass_vmem > vmem_cap_limit

    def _wspecs(idx):
        return [pl.BlockSpec((F_, Ht), idx),
                pl.BlockSpec((Ht, F_), idx),
                pl.BlockSpec((C_, Hc), idx),
                pl.BlockSpec((Hc, C_), idx)]

    if not use_two_pass:
        # -------------------- single fused pass over batch tiles --------------------
        vmem_limit = int(min(vmem_cap_limit, max(32 << 20, single_pass_vmem)))
        folded = (S % 128 != 0) and ((C_ * S) % 128 == 0)      # lane-density guard
        if folded:
            x_in = x.reshape(B, F_, C_ * S)                    # free: row-major collapse
            blk = (b_tile, F_, C_ * S)
            idx_x = lambda b: (b, 0, 0)
        else:
            x_in = x.reshape(B, F_, C_, S)
            blk = (b_tile, F_, C_, S)
            idx_x = lambda b: (b, 0, 0, 0)

        out = pl.pallas_call(
            _make_single_pass_kernel(C_, S, folded),
            out_shape=jax.ShapeDtypeStruct(x_in.shape, x.dtype),
            grid_spec=pltpu.PrefetchScalarGridSpec(
                num_scalar_prefetch=0,
                grid=(B // b_tile,),
                in_specs=[pl.BlockSpec(blk, idx_x)] + _wspecs(lambda b: (0, 0)),
                out_specs=pl.BlockSpec(blk, idx_x),
            ),
            compiler_params=pltpu.CompilerParams(
                dimension_semantics=("parallel",),             # batch tiles independent
                vmem_limit_bytes=vmem_limit,
            ),
        )(x_in, wt1t, wt2t, wc1t, wc2t)
        return out.reshape(B, F_, C_, H, W)

    # -------------------- two-pass S-tiled fallback --------------------
    s_tile = force_s_tile if force_s_tile is not None else _pick_s_tile(
        S, F_ * C_ * itemsize, target_block)
    assert S % s_tile == 0, (S, s_tile)
    x_in = x.reshape(B, F_, C_, S)
    s_block_bytes = F_ * C_ * s_tile * itemsize

    # Pass 1: accumulate pooled stats over S, emit the fused ta*ca scale per batch element.
    reduce_vmem = int(min(vmem_cap_limit, max(32 << 20, 3 * s_block_bytes + (2 << 20))))
    scale = pl.pallas_call(
        _make_reduce_kernel(C_, S, F_),
        out_shape=jax.ShapeDtypeStruct((B, F_, C_), jnp.float32),
        grid_spec=pltpu.PrefetchScalarGridSpec(
            num_scalar_prefetch=0,
            grid=(B, S // s_tile),
            in_specs=[pl.BlockSpec((1, F_, C_, s_tile), lambda b, s: (b, 0, 0, s))]
                     + _wspecs(lambda b, s: (0, 0)),
            out_specs=pl.BlockSpec((1, F_, C_), lambda b, s: (b, 0, 0)),
            scratch_shapes=[pltpu.VMEM((1, F_, C_), jnp.float32),
                            pltpu.VMEM((1, F_, C_), jnp.float32)],
        ),
        compiler_params=pltpu.CompilerParams(
            dimension_semantics=("parallel", "arbitrary"),
            vmem_limit_bytes=reduce_vmem,
        ),
    )(x_in, wt1t, wt2t, wc1t, wc2t)

    # Pass 2: apply combined scale + ReLU, fully tiled.
    apply_vmem = int(min(vmem_cap_limit, max(32 << 20, 5 * s_block_bytes + (2 << 20))))
    out = pl.pallas_call(
        _apply_kernel,
        out_shape=jax.ShapeDtypeStruct((B, F_, C_, S), x.dtype),
        grid_spec=pltpu.PrefetchScalarGridSpec(
            num_scalar_prefetch=0,
            grid=(B, S // s_tile),
            in_specs=[pl.BlockSpec((1, F_, C_), lambda b, s: (b, 0, 0)),
                      pl.BlockSpec((1, F_, C_, s_tile), lambda b, s: (b, 0, 0, s))],
            out_specs=pl.BlockSpec((1, F_, C_, s_tile), lambda b, s: (b, 0, 0, s)),
        ),
        compiler_params=pltpu.CompilerParams(
            dimension_semantics=("parallel", "parallel"),
            vmem_limit_bytes=apply_vmem,
        ),
    )(scale, x_in)
    return out.reshape(B, F_, C_, H, W)


# ----------------------------------------------------------------------------
# Pure-JAX reference mirroring the PyTorch module.
# ----------------------------------------------------------------------------
def tca_ref(x, wt1, wt2, wc1, wc2):
    def mlp(v, w1, w2):  # v: (B, P), w1: (P/r, P), w2: (P, P/r)
        h = jax.nn.relu(jnp.einsum('oi,bi->bo', w1, v))
        return jnp.einsum('oi,bi->bo', w2, h)

    avg_t = x.mean(axis=(2, 3, 4))   # (B, F)
    max_t = x.max(axis=(2, 3, 4))
    ta = jax.nn.sigmoid(mlp(avg_t, wt1, wt2) + mlp(max_t, wt1, wt2))
    out1 = ta[:, :, None, None, None] * x

    avg_c = out1.mean(axis=(1, 3, 4))  # (B, C)
    max_c = out1.max(axis=(1, 3, 4))
    ca = jax.nn.sigmoid(mlp(avg_c, wc1, wc2) + mlp(max_c, wc1, wc2))
    return jax.nn.relu(ca[:, None, :, None, None] * out1)


if __name__ == "__main__":
    # Small shapes consistent with TCA(timeWindows=F, channels=C, c_ratio=4, t_ratio=2)
    B, F_, C_, H, W = 2, 8, 16, 16, 16
    t_ratio, c_ratio = 2, 4
    Ht, Hc = F_ // t_ratio, C_ // c_ratio

    key = jax.random.PRNGKey(0)
    kx, k1, k2, k3, k4 = jax.random.split(key, 5)
    x = jax.random.normal(kx, (B, F_, C_, H, W), jnp.float32)
    # Deterministic synthetic weights (torch Conv*d(out,in,1) layout, bias=False)
    wt1 = 0.3 * jax.random.normal(k1, (Ht, F_), jnp.float32)   # TimeAttention conv1
    wt2 = 0.3 * jax.random.normal(k2, (F_, Ht), jnp.float32)   # TimeAttention conv2
    wc1 = 0.3 * jax.random.normal(k3, (Hc, C_), jnp.float32)   # ChannelAttention conv1
    wc2 = 0.3 * jax.random.normal(k4, (C_, Hc), jnp.float32)   # ChannelAttention conv2

    ref = jax.block_until_ready(tca_ref(x, wt1, wt2, wc1, wc2))

    # Default (single fused pass) path.
    out = jax.block_until_ready(tca_pallas(x, wt1, wt2, wc1, wc2))
    assert out.shape == (B, F_, C_, H, W)
    assert jnp.allclose(out, ref, rtol=1e-4, atol=1e-4), float(jnp.max(jnp.abs(out - ref)))

    # Exercise the large-shape fallback (two-pass S-tiled) at the same small shape.
    out2 = jax.block_until_ready(
        tca_pallas(x, wt1, wt2, wc1, wc2, force_two_pass=True, force_s_tile=128))
    assert out2.shape == (B, F_, C_, H, W)
    assert jnp.allclose(out2, ref, rtol=1e-4, atol=1e-4), float(jnp.max(jnp.abs(out2 - ref)))

    print("KERNEL_OK")
</pallas_src>

<mosaic_0001>
module attributes {stable_mosaic.version = 11 : i64} {
  func.func @kernel(%arg0: i32, %arg1: memref<2x8x16x256xf32, #tpu.memory_space<vmem>>, %arg2: memref<8x4xf32, #tpu.memory_space<vmem>>, %arg3: memref<4x8xf32, #tpu.memory_space<vmem>>, %arg4: memref<16x4xf32, #tpu.memory_space<vmem>>, %arg5: memref<4x16xf32, #tpu.memory_space<vmem>>, %arg6: memref<2x8x16x256xf32, #tpu.memory_space<vmem>>) attributes {dimension_semantics = [#tpu.dimension_semantics<parallel>], iteration_bounds = array<i64: 1>, scalar_prefetch = 0 : i64, scratch_operands = 0 : i64, tpu.core_type = #tpu.core_type<tc>, window_params = [{transform_indices = @transform_0, window_bounds = array<i64: 2, 8, 16, 256>}, {pipeline_mode = #tpu.pipeline_mode<synchronous>, transform_indices = @transform_1, window_bounds = array<i64: 8, 4>}, {pipeline_mode = #tpu.pipeline_mode<synchronous>, transform_indices = @transform_2, window_bounds = array<i64: 4, 8>}, {pipeline_mode = #tpu.pipeline_mode<synchronous>, transform_indices = @transform_3, window_bounds = array<i64: 16, 4>}, {pipeline_mode = #tpu.pipeline_mode<synchronous>, transform_indices = @transform_4, window_bounds = array<i64: 4, 16>}, {transform_indices = @transform_5, window_bounds = array<i64: 2, 8, 16, 256>}]} {
    %c0 = arith.constant 0 : index
    %c0_0 = arith.constant 0 : index
    %c0_1 = arith.constant 0 : index
    %c0_2 = arith.constant 0 : index
    %0 = vector.load %arg1[%c0, %c0_0, %c0_1, %c0_2] : memref<2x8x16x256xf32, #tpu.memory_space<vmem>>, vector<2x8x16x256xf32>
    %cst = arith.constant dense<0.000000e+00> : vector<2x8x16xf32>
    %1 = vector.multi_reduction <add>, %0, %cst [3] : vector<2x8x16x256xf32> to vector<2x8x16xf32>
    %cst_3 = arith.constant dense<0xFF800000> : vector<2x8x16xf32>
    %2 = vector.multi_reduction <maximumf>, %0, %cst_3 [3] : vector<2x8x16x256xf32> to vector<2x8x16xf32>
    %c0_4 = arith.constant 0 : index
    %c0_5 = arith.constant 0 : index
    %3 = vector.load %arg2[%c0_4, %c0_5] : memref<8x4xf32, #tpu.memory_space<vmem>>, vector<8x4xf32>
    %c0_6 = arith.constant 0 : index
    %c0_7 = arith.constant 0 : index
    %4 = vector.load %arg3[%c0_6, %c0_7] : memref<4x8xf32, #tpu.memory_space<vmem>>, vector<4x8xf32>
    %c0_8 = arith.constant 0 : index
    %c0_9 = arith.constant 0 : index
    %5 = vector.load %arg4[%c0_8, %c0_9] : memref<16x4xf32, #tpu.memory_space<vmem>>, vector<16x4xf32>
    %c0_10 = arith.constant 0 : index
    %c0_11 = arith.constant 0 : index
    %6 = vector.load %arg5[%c0_10, %c0_11] : memref<4x16xf32, #tpu.memory_space<vmem>>, vector<4x16xf32>
    %cst_12 = arith.constant dense<0.000000e+00> : vector<2x8xf32>
    %7 = vector.multi_reduction <add>, %1, %cst_12 [2] : vector<2x8x16xf32> to vector<2x8xf32>
    %cst_13 = arith.constant 2.44140625E-4 : f32
    %8 = vector.broadcast %cst_13 : f32 to vector<2x8xf32>
    %9 = arith.mulf %7, %8 : vector<2x8xf32>
    %cst_14 = arith.constant dense<0xFF800000> : vector<2x8xf32>
    %10 = vector.multi_reduction <maximumf>, %2, %cst_14 [2] : vector<2x8x16xf32> to vector<2x8xf32>
    %11 = tpu.concatenate %9, %10 in 0 : vector<2x8xf32>, vector<2x8xf32> -> vector<4x8xf32>
    %cst_15 = arith.constant dense<0.000000e+00> : vector<4x4xf32>
    %12 = tpu.matmul %11, %3, %cst_15 {dimension_numbers = #tpu.dot_dimension_numbers<[1], [0], [0], [1], [0, 0, 1, 1], [], []>} : vector<4x8xf32>, vector<8x4xf32>, vector<4x4xf32> -> vector<4x4xf32>
    %cst_16 = arith.constant 0.000000e+00 : f32
    %13 = vector.broadcast %cst_16 : f32 to vector<4x4xf32>
    %14 = arith.maximumf %12, %13 : vector<4x4xf32>
    %cst_17 = arith.constant dense<0.000000e+00> : vector<4x8xf32>
    %15 = tpu.matmul %14, %4, %cst_17 {dimension_numbers = #tpu.dot_dimension_numbers<[1], [0], [0], [1], [0, 0, 1, 1], [], []>} : vector<4x4xf32>, vector<4x8xf32>, vector<4x8xf32> -> vector<4x8xf32>
    %16 = vector.extract_strided_slice %15 {offsets = [0, 0], sizes = [2, 8], strides = [1, 1]} : vector<4x8xf32> to vector<2x8xf32>
    %17 = vector.extract_strided_slice %15 {offsets = [2, 0], sizes = [2, 8], strides = [1, 1]} : vector<4x8xf32> to vector<2x8xf32>
    %18 = arith.addf %16, %17 : vector<2x8xf32>
    %19 = arith.negf %18 : vector<2x8xf32>
    %20 = math.exp %19 : vector<2x8xf32>
    %cst_18 = arith.constant 1.000000e+00 : f32
    %21 = vector.broadcast %cst_18 : f32 to vector<2x8xf32>
    %22 = arith.addf %21, %20 : vector<2x8xf32>
    %23 = arith.divf %21, %22 : vector<2x8xf32>
    %24 = vector.shape_cast %23 : vector<2x8xf32> to vector<2x8x1xf32>
    %25 = vector.broadcast %24 : vector<2x8x1xf32> to vector<2x8x16xf32>
    %26 = arith.mulf %25, %1 : vector<2x8x16xf32>
    %cst_19 = arith.constant dense<0.000000e+00> : vector<2x16xf32>
    %27 = vector.multi_reduction <add>, %26, %cst_19 [1] : vector<2x8x16xf32> to vector<2x16xf32>
    %cst_20 = arith.constant 4.8828125E-4 : f32
    %28 = vector.broadcast %cst_20 : f32 to vector<2x16xf32>
    %29 = arith.mulf %27, %28 : vector<2x16xf32>
    %30 = vector.shape_cast %23 : vector<2x8xf32> to vector<2x8x1xf32>
    %31 = vector.broadcast %30 : vector<2x8x1xf32> to vector<2x8x16xf32>
    %32 = arith.mulf %31, %2 : vector<2x8x16xf32>
    %cst_21 = arith.constant dense<0xFF800000> : vector<2x16xf32>
    %33 = vector.multi_reduction <maximumf>, %32, %cst_21 [1] : vector<2x8x16xf32> to vector<2x16xf32>
    %34 = tpu.concatenate %29, %33 in 0 : vector<2x16xf32>, vector<2x16xf32> -> vector<4x16xf32>
    %cst_22 = arith.constant dense<0.000000e+00> : vector<4x4xf32>
    %35 = tpu.matmul %34, %5, %cst_22 {dimension_numbers = #tpu.dot_dimension_numbers<[1], [0], [0], [1], [0, 0, 1, 1], [], []>} : vector<4x16xf32>, vector<16x4xf32>, vector<4x4xf32> -> vector<4x4xf32>
    %cst_23 = arith.constant 0.000000e+00 : f32
    %36 = vector.broadcast %cst_23 : f32 to vector<4x4xf32>
    %37 = arith.maximumf %35, %36 : vector<4x4xf32>
    %cst_24 = arith.constant dense<0.000000e+00> : vector<4x16xf32>
    %38 = tpu.matmul %37, %6, %cst_24 {dimension_numbers = #tpu.dot_dimension_numbers<[1], [0], [0], [1], [0, 0, 1, 1], [], []>} : vector<4x4xf32>, vector<4x16xf32>, vector<4x16xf32> -> vector<4x16xf32>
    %39 = vector.extract_strided_slice %38 {offsets = [0, 0], sizes = [2, 16], strides = [1, 1]} : vector<4x16xf32> to vector<2x16xf32>
    %40 = vector.extract_strided_slice %38 {offsets = [2, 0], sizes = [2, 16], strides = [1, 1]} : vector<4x16xf32> to vector<2x16xf32>
    %41 = arith.addf %39, %40 : vector<2x16xf32>
    %42 = arith.negf %41 : vector<2x16xf32>
    %43 = math.exp %42 : vector<2x16xf32>
    %cst_25 = arith.constant 1.000000e+00 : f32
    %44 = vector.broadcast %cst_25 : f32 to vector<2x16xf32>
    %45 = arith.addf %44, %43 : vector<2x16xf32>
    %46 = arith.divf %44, %45 : vector<2x16xf32>
    %47 = vector.shape_cast %23 : vector<2x8xf32> to vector<2x8x1xf32>
    %48 = vector.shape_cast %46 : vector<2x16xf32> to vector<2x1x16xf32>
    %49 = vector.broadcast %47 : vector<2x8x1xf32> to vector<2x8x16xf32>
    %50 = vector.broadcast %48 : vector<2x1x16xf32> to vector<2x8x16xf32>
    %51 = arith.mulf %49, %50 : vector<2x8x16xf32>
    %52 = vector.shape_cast %51 : vector<2x8x16xf32> to vector<2x8x16x1xf32>
    %53 = vector.broadcast %52 : vector<2x8x16x1xf32> to vector<2x8x16x256xf32>
    %54 = arith.mulf %53, %0 : vector<2x8x16x256xf32>
    %cst_26 = arith.constant 0.000000e+00 : f32
    %55 = vector.broadcast %cst_26 : f32 to vector<2x8x16x256xf32>
    %56 = arith.maximumf %54, %55 : vector<2x8x16x256xf32>
    %c0_27 = arith.constant 0 : index
    %c0_28 = arith.constant 0 : index
    %c0_29 = arith.constant 0 : index
    %c0_30 = arith.constant 0 : index
    %57 = vector.load %arg6[%c0_27, %c0_28, %c0_29, %c0_30] : memref<2x8x16x256xf32, #tpu.memory_space<vmem>>, vector<2x8x16x256xf32>
    tpu.vector_store %arg6[%c0_27, %c0_28, %c0_29, %c0_30], %56 {strides = array<i32>} : memref<2x8x16x256xf32, #tpu.memory_space<vmem>>, vector<2x8x16x256xf32>,
    return
  }
  func.func @transform_0(%arg0: i32) -> (i32, i32, i32, i32) {
    %c0_i32 = arith.constant 0 : i32
    %c0_i32_0 = arith.constant 0 : i32
    %c0_i32_1 = arith.constant 0 : i32
    %c0_i32_2 = arith.constant 0 : i32
    return %arg0, %c0_i32, %c0_i32_0, %c0_i32_1 : i32, i32, i32, i32
  }
  func.func @transform_1(%arg0: i32) -> (i32, i32) {
    %c0_i32 = arith.constant 0 : i32
    %c0_i32_0 = arith.constant 0 : i32
    %c0_i32_1 = arith.constant 0 : i32
    return %c0_i32, %c0_i32_0 : i32, i32
  }
  func.func @transform_2(%arg0: i32) -> (i32, i32) {
    %c0_i32 = arith.constant 0 : i32
    %c0_i32_0 = arith.constant 0 : i32
    %c0_i32_1 = arith.constant 0 : i32
    return %c0_i32, %c0_i32_0 : i32, i32
  }
  func.func @transform_3(%arg0: i32) -> (i32, i32) {
    %c0_i32 = arith.constant 0 : i32
    %c0_i32_0 = arith.constant 0 : i32
    %c0_i32_1 = arith.constant 0 : i32
    return %c0_i32, %c0_i32_0 : i32, i32
  }
  func.func @transform_4(%arg0: i32) -> (i32, i32) {
    %c0_i32 = arith.constant 0 : i32
    %c0_i32_0 = arith.constant 0 : i32
    %c0_i32_1 = arith.constant 0 : i32
    return %c0_i32, %c0_i32_0 : i32, i32
  }
  func.func @transform_5(%arg0: i32) -> (i32, i32, i32, i32) {
    %c0_i32 = arith.constant 0 : i32
    %c0_i32_0 = arith.constant 0 : i32
    %c0_i32_1 = arith.constant 0 : i32
    %c0_i32_2 = arith.constant 0 : i32
    return %arg0, %c0_i32, %c0_i32_0, %c0_i32_1 : i32, i32, i32, i32
  }
}

</mosaic_0001>

<bundles_post_ra>
// kernel: tpu_custom_call.1
= control target key start
LH: loop header
LB: loop body
LE: loop exit
PB: predicated region body
PF: predicated region fallthrough
CT: control target
= control target key end

     0   :  { %10 = vsyncpa [#allocation3], 0  ;;  %s2186_s0 = inlined_call_operand.hbm [shape: f32[2,8,16,256], index: 0, kind: input, shape index: {}]   ;;  %s2187_s1 = inlined_call_operand.vmem [shape: f32[8,4], index: 1, kind: input, shape index: {}]   ;;  %s2188_s2 = inlined_call_operand.vmem [shape: f32[4,8], index: 2, kind: input, shape index: {}]   ;;  %s2189_s3 = inlined_call_operand.vmem [shape: f32[16,4], index: 3, kind: input, shape index: {}]   ;;  %s2190_s4 = inlined_call_operand.vmem [shape: f32[4,16], index: 4, kind: input, shape index: {}]   ;;  %s2191_s5 = inlined_call_operand.hbm [shape: f32[2,8,16,256], index: 5, kind: output, shape index: {}]  }
   0x1   :  { %11 = vsyncpa [#allocation4], 0  ;;  %s1702_s18 = smov [#allocation2]   ;;  %s1654_s22 = scalar_lea.hbm %s2186_s0, 8192 }
   0x2   :  { %s17_s19 = sshll.u32 %s1702_s18, 4  ;;  %p1655_p0 = scmp.ne.s32.totalorder %s2186_s0, %s1654_s22  ;;  %s18_s19 = int_to_ptr.vmem [resolvable:$true] %s17_s19 }
   0x3   :  { %p1658_p1 = scmp.lt.u32.totalorder %s1654_s22, %s2186_s0 }
   0x5   :  { %p1660_p2 = pnand %p1658_p1, %p1655_p0 }
   0x7   :  { %1663 = shalt.err (!%p1660_p2)
}
   0x8   :  { %s1664_s27 = scalar_lea.vmem %s18_s19, 8192  ;;  %p1669_p4 = scmp.lt.s32.totalorder %s18_s19, %s18_s19 }
   0x9   :  { %p1665_p3 = scmp.ne.s32.totalorder %s18_s19, %s1664_s27  ;;  %p1670_p5 = scmp.lt.s32.totalorder %s1664_s27, %s1664_s27 }
   0xb   :  { %p1671_p6 = por %p1670_p5, %p1669_p4 }
   0xd   :  { %p1672_p7 = pnand %p1671_p6, %p1665_p3 }
   0xf   :  { %1675 = shalt.err (!%p1672_p7)
}
  0x10   :  { %s1703_s28 = smov 256   ;;  %s1704_s29 = smov 16  }
  0x11   :  { %23 = dma.hbm_to_vmem [thread:$0]  %s2186_s0, 8192, %s18_s19, [#allocation3], %s1703_s28, %s1703_s28, %s1704_s29  }
  0x12   :  { %1698 = dma.done.wait [#allocation3], 8192  }
  0x13   :  { %1699 = vsyncadd [#allocation3], 4294959104  ;;  %v1755_v0 = vld [vmem:[#allocation2 + $0x20] sm:$0xff]  ;;  %v1757_v1 = vld [vmem:[#allocation2 + $0x28] sm:$0xff]  ;;  %vm339_vm0 = vcmask 130112   ;;  %vm476_vm1 = vcmask 1041409  }
  0x14   :  { %v1759_v2 = vld [vmem:[#allocation2] sm:$0xff]  ;;  %v105_v3 = vadd.f32 %v1757_v1, %v1755_v0  ;;  %v1763_v4 = vld [vmem:[#allocation2 + $0x8] sm:$0xff]  ;;  %v1765_v5 = vld [vmem:[#allocation2 + $0x30] sm:$0xff]  ;;  %v201_v51 = vmax.f32 %v1755_v0, %v1757_v1  ;;  %vm478_vm2 = vcmask 1042434   ;;  %vm480_vm3 = vcmask 1043459  }
  0x15   :  { %v1767_v6 = vld [vmem:[#allocation2 + $0x38] sm:$0xff]  ;;  %v99_v7 = vadd.f32 %v1763_v4, %v1759_v2  ;;  %v37_v8 = vld [vmem:[#allocation2 + $0x10] sm:$0xff]  ;;  %v67_v14 = vld [vmem:[#allocation2 + $0x100] sm:$0xff]  ;;  %v195_v49 = vmax.f32 %v1759_v2, %v1763_v4  ;;  %vm482_vm4 = vcmask 1044484   ;;  %vm484_vm5 = vcmask 1045509  }
  0x16   :  { %v38_v9 = vld [vmem:[#allocation2 + $0x18] sm:$0xff]  ;;  %106 = vadd.xlane.f32.xlu1 %v105_v3  ;;  %v108_v10 = vadd.f32 %v1767_v6, %v1765_v5  ;;  %v69_v12 = vld [vmem:[#allocation2 + $0x110] sm:$0xff]  ;;  %v68_v15 = vld [vmem:[#allocation2 + $0x108] sm:$0xff]  ;;  %v204_v50 = vmax.f32 %v1765_v5, %v1767_v6  ;;  %vm486_vm6 = vcmask 1046534   ;;  %vm488_vm7 = vcmask 1047559  }
  0x17   :  { %100 = vadd.xlane.f32.xlu0 %v99_v7  ;;  %v102_v11 = vadd.f32 %v38_v9, %v37_v8  ;;  %v70_v13 = vld [vmem:[#allocation2 + $0x118] sm:$0xff]  ;;  %v147_v17 = vadd.f32 %v68_v15, %v67_v14  ;;  %v73_v18 = vld [vmem:[#allocation2 + $0x130] sm:$0xff]  ;;  %v71_v20 = vld [vmem:[#allocation2 + $0x120] sm:$0xff]  ;;  %v198_v48 = vmax.f32 %v37_v8, %v38_v9  ;;  %v243_v53 = vmax.f32 %v67_v14, %v68_v15 }
  0x18   :  { %v150_v16 = vadd.f32 %v70_v13, %v69_v12  ;;  %v74_v19 = vld [vmem:[#allocation2 + $0x138] sm:$0xff]  ;;  %v72_v21 = vld [vmem:[#allocation2 + $0x128] sm:$0xff]  ;;  %v1773_v24 = vld [vmem:[#allocation2 + $0x50] sm:$0xff]  ;;  %v246_v52 = vmax.f32 %v69_v12, %v70_v13  ;;  %vm499_vm8 = vcmask 130048   ;;  %vm1706_vm9 = vmmov 0  }
  0x19   :  { %v156_v22 = vadd.f32 %v74_v19, %v73_v18  ;;  %v153_v23 = vadd.f32 %v72_v21, %v71_v20  ;;  %v1775_v25 = vld [vmem:[#allocation2 + $0x58] sm:$0xff]  ;;  %v1777_v26 = vld [vmem:[#allocation2 + $0x40] sm:$0xff]  ;;  %v1779_v27 = vld [vmem:[#allocation2 + $0x48] sm:$0xff]  ;;  %v252_v54 = vmax.f32 %v73_v18, %v74_v19  ;;  %v249_v55 = vmax.f32 %v71_v20, %v72_v21 }
  0x1a   :  { %109 = vadd.xlane.f32.xlu1 %v108_v10  ;;  %v114_v28 = vadd.f32 %v1775_v25, %v1773_v24  ;;  %v111_v29 = vadd.f32 %v1779_v27, %v1777_v26  ;;  %v1785_v30 = vld [vmem:[#allocation2 + $0x150] sm:$0xff]  ;;  %v1787_v31 = vld [vmem:[#allocation2 + $0x158] sm:$0xff]  ;;  %v1789_v32 = vld [vmem:[#allocation2 + $0x140] sm:$0xff]  ;;  %v210_v4 = vmax.f32 %v1773_v24, %v1775_v25  ;;  %v207_v5 = vmax.f32 %v1777_v26, %v1779_v27 }
  0x1b   :  { %103 = vadd.xlane.f32.xlu0 %v102_v11  ;;  %v1791_v33 = vld [vmem:[#allocation2 + $0x148] sm:$0xff]  ;;  %v162_v34 = vadd.f32 %v1787_v31, %v1785_v30  ;;  %v1797_v36 = vld [vmem:[#allocation2 + $0x70] sm:$0xff]  ;;  %v1799_v37 = vld [vmem:[#allocation2 + $0x78] sm:$0xff]  ;;  %v258_v6 = vmax.f32 %v1785_v30, %v1787_v31  ;;  %vm730_vm10 = vcmask 1041408   ;;  %vm732_vm11 = vcmask 64512  }
  0x1c   :  { %v159_v35 = vadd.f32 %v1791_v33, %v1789_v32  ;;  %v1801_v38 = vld [vmem:[#allocation2 + $0x60] sm:$0xff]  ;;  %v1803_v39 = vld [vmem:[#allocation2 + $0x68] sm:$0xff]  ;;  %v120_v40 = vadd.f32 %v1799_v37, %v1797_v36  ;;  %v1809_v42 = vld [vmem:[#allocation2 + $0x170] sm:$0xff]  ;;  %v255_v7 = vmax.f32 %v1789_v32, %v1791_v33  ;;  %v216_v20 = vmax.f32 %v1797_v36, %v1799_v37 }
  0x1d   :  { %v117_v41 = vadd.f32 %v1803_v39, %v1801_v38  ;;  %v1811_v43 = vld [vmem:[#allocation2 + $0x178] sm:$0xff]  ;;  %v1813_v44 = vld [vmem:[#allocation2 + $0x160] sm:$0xff]  ;;  %v1815_v45 = vld [vmem:[#allocation2 + $0x168] sm:$0xff]  ;;  %v213_v21 = vmax.f32 %v1801_v38, %v1803_v39  ;;  %vm811_vm12 = vcmask 1043456   ;;  %vm807_vm13 = vcmask 31744  }
  0x1e   :  { %151 = vadd.xlane.f32.xlu1 %v150_v16  ;;  %v168_v46 = vadd.f32 %v1811_v43, %v1809_v42  ;;  %v165_v47 = vadd.f32 %v1815_v45, %v1813_v44  ;;  %v1827_v56 = vld [vmem:[#allocation2 + $0x90] sm:$0xff]  ;;  %v1829_v57 = vld [vmem:[#allocation2 + $0x98] sm:$0xff]  ;;  %v1831_v58 = vld [vmem:[#allocation2 + $0x80] sm:$0xff] }
  0x1f   :  { %148 = vadd.xlane.f32.xlu0 %v147_v17  ;;  %v1833_v59 = vld [vmem:[#allocation2 + $0x88] sm:$0xff]  ;;  %v126_v60 = vadd.f32 %v1829_v57, %v1827_v56  ;;  %v1839_v62 = vld [vmem:[#allocation2 + $0x190] sm:$0xff]  ;;  %v1841_v63 = vld [vmem:[#allocation2 + $0x198] sm:$0xff]  ;;  %v222_v36 = vmax.f32 %v1827_v56, %v1829_v57 }
  0x20   :  { %v123_v61 = vadd.f32 %v1833_v59, %v1831_v58  ;;  %v1843_v0 = vld [vmem:[#allocation2 + $0x180] sm:$0xff]  ;;  %v1845_v1 = vld [vmem:[#allocation2 + $0x188] sm:$0xff]  ;;  %v174_v2 = vadd.f32 %v1841_v63, %v1839_v62  ;;  %v1859_v8 = vld [vmem:[#allocation2 + $0xb0] sm:$0xff]  ;;  %v219_v37 = vmax.f32 %v1831_v58, %v1833_v59  ;;  %v270_v38 = vmax.f32 %v1839_v62, %v1841_v63 }
  0x21   :  { %v171_v3 = vadd.f32 %v1845_v1, %v1843_v0  ;;  %v1861_v9 = vld [vmem:[#allocation2 + $0xb8] sm:$0xff]  ;;  %v1863_v10 = vld [vmem:[#allocation2 + $0xa0] sm:$0xff]  ;;  %v1865_v11 = vld [vmem:[#allocation2 + $0xa8] sm:$0xff]  ;;  %v267_v39 = vmax.f32 %v1843_v0, %v1845_v1  ;;  %v328_v0 = vlaneseq }
  0x22   :  { %157 = vadd.xlane.f32.xlu1 %v156_v22  ;;  %v132_v12 = vadd.f32 %v1861_v9, %v1859_v8  ;;  %v129_v13 = vadd.f32 %v1865_v11, %v1863_v10  ;;  %v1871_v14 = vld [vmem:[#allocation2 + $0x1b0] sm:$0xff]  ;;  %v1873_v15 = vld [vmem:[#allocation2 + $0x1b8] sm:$0xff]  ;;  %v1875_v16 = vld [vmem:[#allocation2 + $0x1a0] sm:$0xff]  ;;  %v264_v22 = vmax.f32 %v1809_v42, %v1811_v43 }
  0x23   :  { %154 = vadd.xlane.f32.xlu0 %v153_v23  ;;  %v1877_v17 = vld [vmem:[#allocation2 + $0x1a8] sm:$0xff]  ;;  %v180_v18 = vadd.f32 %v1873_v15, %v1871_v14  ;;  %v261_v23 = vmax.f32 %v1813_v44, %v1815_v45  ;;  %v61_v24 = vld [vmem:[#allocation2 + $0xd0] sm:$0xff]  ;;  %v62_v25 = vld [vmem:[#allocation2 + $0xd8] sm:$0xff] }
  0x24   :  { %v177_v19 = vadd.f32 %v1877_v17, %v1875_v16  ;;  %v59_v26 = vld [vmem:[#allocation2 + $0xc0] sm:$0xff]  ;;  %v60_v27 = vld [vmem:[#allocation2 + $0xc8] sm:$0xff]  ;;  %v93_v30 = vld [vmem:[#allocation2 + $0x1d0] sm:$0xff]  ;;  %v234_v56 = vmax.f32 %v61_v24, %v62_v25 }
  0x25   :  { %v94_v31 = vld [vmem:[#allocation2 + $0x1d8] sm:$0xff]  ;;  %v91_v32 = vld [vmem:[#allocation2 + $0x1c0] sm:$0xff]  ;;  %v92_v33 = vld [vmem:[#allocation2 + $0x1c8] sm:$0xff]  ;;  %v231_v57 = vmax.f32 %v59_v26, %v60_v27 }
  0x26   :  { %115 = vadd.xlane.f32.xlu1 %v114_v28  ;;  %v138_v28 = vadd.f32 %v62_v25, %v61_v24  ;;  %v63_v42 = vld [vmem:[#allocation2 + $0xe0] sm:$0xff]  ;;  %v64_v43 = vld [vmem:[#allocation2 + $0xe8] sm:$0xff]  ;;  %v282_v58 = vmax.f32 %v93_v30, %v94_v31  ;;  %v279_v59 = vmax.f32 %v91_v32, %v92_v33 }
  0x27   :  { %112 = vadd.xlane.f32.xlu0 %v111_v29  ;;  %v135_v29 = vadd.f32 %v60_v27, %v59_v26  ;;  %v141_v45 = vadd.f32 %v64_v43, %v63_v42 }
  0x2a   :  { %163 = vadd.xlane.f32.xlu1 %v162_v34  ;;  %v186_v34 = vadd.f32 %v94_v31, %v93_v30 }
  0x2b   :  { %160 = vadd.xlane.f32.xlu0 %v159_v35  ;;  %v183_v35 = vadd.f32 %v92_v33, %v91_v32 }
  0x2e   :  { %121 = vadd.xlane.f32.xlu1 %v120_v40  ;;  %v65_v40 = vld [vmem:[#allocation2 + $0xf0] sm:$0xff] }
  0x2f   :  { %118 = vadd.xlane.f32.xlu0 %v117_v41  ;;  %v66_v41 = vld [vmem:[#allocation2 + $0xf8] sm:$0xff] }
  0x30   :  { %v144_v44 = vadd.f32 %v66_v41, %v65_v40 }
  0x32   :  { %169 = vadd.xlane.f32.xlu1 %v168_v46  ;;  %v97_v46 = vld [vmem:[#allocation2 + $0x1f0] sm:$0xff] }
  0x33   :  { %166 = vadd.xlane.f32.xlu0 %v165_v47  ;;  %v98_v47 = vld [vmem:[#allocation2 + $0x1f8] sm:$0xff] }
  0x34   :  { %v288_v62 = vmax.f32 %v97_v46, %v98_v47 }
  0x36   :  { %199 = vmax.xlane.f32.xlu1 %v198_v48  ;;  %v95_v48 = vld [vmem:[#allocation2 + $0x1e0] sm:$0xff] }
  0x37   :  { %196 = vmax.xlane.f32.xlu0 %v195_v49  ;;  %v96_v49 = vld [vmem:[#allocation2 + $0x1e8] sm:$0xff] }
  0x38   :  { %v285_v63 = vmax.f32 %v95_v48, %v96_v49 }
  0x3a   :  { %205 = vmax.xlane.f32.xlu1 %v204_v50  ;;  %v192_v50 = vadd.f32 %v98_v47, %v97_v46 }
  0x3b   :  { %202 = vmax.xlane.f32.xlu0 %v201_v51  ;;  %v189_v51 = vadd.f32 %v96_v49, %v95_v48 }
  0x3e   :  { %247 = vmax.xlane.f32.xlu1 %v246_v52  ;;  %v228_v52 = vmax.f32 %v1859_v8, %v1861_v9 }
  0x3f   :  { %244 = vmax.xlane.f32.xlu0 %v243_v53  ;;  %v225_v53 = vmax.f32 %v1863_v10, %v1865_v11 }
  0x42   :  { %253 = vmax.xlane.f32.xlu1 %v252_v54  ;;  %v276_v54 = vmax.f32 %v1871_v14, %v1873_v15 }
  0x43   :  { %250 = vmax.xlane.f32.xlu0 %v249_v55  ;;  %v273_v55 = vmax.f32 %v1875_v16, %v1877_v17 }
  0x46   :  { %127 = vadd.xlane.f32.xlu1 %v126_v60  ;;  %v240_v60 = vmax.f32 %v65_v40, %v66_v41 }
  0x47   :  { %124 = vadd.xlane.f32.xlu0 %v123_v61  ;;  %v237_v61 = vmax.f32 %v63_v42, %v64_v43 }
  0x4a   :  { %175 = vadd.xlane.f32.xlu1 %v174_v2 }
  0x4b   :  { %172 = vadd.xlane.f32.xlu0 %v171_v3  ;;  %v329_v3 = vand.u32 127, %v328_v0 }
  0x4e   :  { %211 = vmax.xlane.f32.xlu1 %v210_v4 }
  0x4f   :  { %208 = vmax.xlane.f32.xlu0 %v207_v5  ;;  %v334_v5 = vadd.s32 4294967288, %v329_v3 }
  0x52   :  { %259 = vmax.xlane.f32.xlu1 %v258_v6 }
  0x53   :  { %256 = vmax.xlane.f32.xlu0 %v255_v7  ;;  %v1907_v7 = vshrl.u32 %v328_v0, 7 }
  0x55   :  { %v1910_v9 = vsub.s32 %v334_v5, %v1907_v7  ;;  %v1913_v11 = vsub.s32 %v329_v3, %v1907_v7 }
  0x56   :  { %133 = vadd.xlane.f32.xlu1 %v132_v12 }
  0x57   :  { %130 = vadd.xlane.f32.xlu0 %v129_v13 }
  0x5a   :  { %181 = vadd.xlane.f32.xlu1 %v180_v18 }
  0x5b   :  { %178 = vadd.xlane.f32.xlu0 %v177_v19 }
  0x5e   :  { %217 = vmax.xlane.f32.xlu1 %v216_v20 }
  0x5f   :  { %214 = vmax.xlane.f32.xlu0 %v213_v21 }
  0x62   :  { %265 = vmax.xlane.f32.xlu1 %v264_v22 }
  0x63   :  { %262 = vmax.xlane.f32.xlu0 %v261_v23 }
  0x66   :  { %139 = vadd.xlane.f32.xlu1 %v138_v28 }
  0x67   :  { %136 = vadd.xlane.f32.xlu0 %v135_v29 }
  0x6a   :  { %187 = vadd.xlane.f32.xlu1 %v186_v34 }
  0x6b   :  { %184 = vadd.xlane.f32.xlu0 %v183_v35 }
  0x6e   :  { %223 = vmax.xlane.f32.xlu1 %v222_v36 }
  0x6f   :  { %220 = vmax.xlane.f32.xlu0 %v219_v37 }
  0x72   :  { %271 = vmax.xlane.f32.xlu1 %v270_v38 }
  0x73   :  { %268 = vmax.xlane.f32.xlu0 %v267_v39 }
  0x76   :  { %145 = vadd.xlane.f32.xlu1 %v144_v44 }
  0x77   :  { %142 = vadd.xlane.f32.xlu0 %v141_v45 }
  0x7a   :  { %193 = vadd.xlane.f32.xlu1 %v192_v50 }
  0x7b   :  { %190 = vadd.xlane.f32.xlu0 %v189_v51 }
  0x7e   :  { %229 = vmax.xlane.f32.xlu1 %v228_v52 }
  0x7f   :  { %226 = vmax.xlane.f32.xlu0 %v225_v53 }
  0x82   :  { %277 = vmax.xlane.f32.xlu1 %v276_v54 }
  0x83   :  { %274 = vmax.xlane.f32.xlu0 %v273_v55 }
  0x86   :  { %235 = vmax.xlane.f32.xlu1 %v234_v56 }
  0x87   :  { %232 = vmax.xlane.f32.xlu0 %v231_v57 }
  0x8a   :  { %283 = vmax.xlane.f32.xlu1 %v282_v58 }
  0x8b   :  { %280 = vmax.xlane.f32.xlu0 %v279_v59 }
  0x8e   :  { %241 = vmax.xlane.f32.xlu1 %v240_v60 }
  0x8f   :  { %238 = vmax.xlane.f32.xlu0 %v237_v61 }
  0x92   :  { %289 = vmax.xlane.f32.xlu1 %v288_v62 }
  0x93   :  { %286 = vmax.xlane.f32.xlu0 %v285_v63 }
  0xa3   :  { %v107_v1 = vpop.xlane.xlu1 %106 }
  0xa4   :  { %v101_v2 = vpop.xlane.xlu0 %100  ;;  %v344_v20 = vrot.slane %v107_v1, %v1913_v11 }
  0xa5   :  { %v333_v21 = vrot.slane %v101_v2, %v1913_v11 }
  0xa7   :  { %v110_v4 = vpop.xlane.xlu1 %109 }
  0xa8   :  { %v104_v6 = vpop.xlane.xlu0 %103  ;;  %v348_v15 = vrot.slane %v110_v4, %v1910_v9 }
  0xa9   :  { %v338_v16 = vrot.slane %v104_v6, %v1910_v9 }
  0xaa   :  { %v349_v25 = vsel %vm339_vm0, %v348_v15, %v344_v20 }
  0xab   :  { %v152_v8 = vpop.xlane.xlu1 %151  ;;  %v340_v26 = vsel %vm339_vm0, %v338_v16, %v333_v21 }
  0xac   :  { %v149_v10 = vpop.xlane.xlu0 %148  ;;  %v411_v12 = vrot.slane %v152_v8, %v1910_v9  ;;  %v477_v31 = vsel %vm476_vm1, %v349_v25, %v340_v26 }
  0xad   :  { %v407_v13 = vrot.slane %v149_v10, %v1913_v11 }
  0xaf   :  { %v158_v14 = vpop.xlane.xlu1 %157  ;;  %v412_v22 = vsel %vm339_vm0, %v411_v12, %v407_v13 }
  0xb0   :  { %v420_v17 = vrot.slane %v158_v14, %v1910_v9  ;;  %v155_v18 = vpop.xlane.xlu0 %154 }
  0xb1   :  { %v416_v19 = vrot.slane %v155_v18, %v1913_v11 }
  0xb3   :  { %v421_v23 = vsel %vm339_vm0, %v420_v17, %v416_v19  ;;  %v116_v24 = vpop.xlane.xlu1 %115 }
  0xb4   :  { %v490_v27 = vsel %vm476_vm1, %v421_v23, %v412_v22  ;;  %v357_v28 = vrot.slane %v116_v24, %v1910_v9  ;;  %v113_v29 = vpop.xlane.xlu0 %112 }
  0xb5   :  { %v353_v30 = vrot.slane %v113_v29, %v1913_v11 }
  0xb7   :  { %v358_v32 = vsel %vm339_vm0, %v357_v28, %v353_v30  ;;  %v164_v33 = vpop.xlane.xlu1 %163 }
  0xb8   :  { %v479_v34 = vsel %vm478_vm2, %v358_v32, %v477_v31  ;;  %v429_v35 = vrot.slane %v164_v33, %v1910_v9  ;;  %v161_v36 = vpop.xlane.xlu0 %160 }
  0xb9   :  { %v425_v37 = vrot.slane %v161_v36, %v1913_v11 }
  0xbb   :  { %v430_v38 = vsel %vm339_vm0, %v429_v35, %v425_v37  ;;  %v122_v39 = vpop.xlane.xlu1 %121 }
  0xbc   :  { %v491_v40 = vsel %vm478_vm2, %v430_v38, %v490_v27  ;;  %v366_v41 = vrot.slane %v122_v39, %v1910_v9  ;;  %v119_v42 = vpop.xlane.xlu0 %118 }
  0xbd   :  { %v362_v43 = vrot.slane %v119_v42, %v1913_v11 }
  0xbf   :  { %v367_v44 = vsel %vm339_vm0, %v366_v41, %v362_v43  ;;  %v170_v45 = vpop.xlane.xlu1 %169 }
  0xc0   :  { %v1941_v46 = vsel %vm480_vm3, %v367_v44, %v479_v34  ;;  %v438_v47 = vrot.slane %v170_v45, %v1910_v9  ;;  %v167_v48 = vpop.xlane.xlu0 %166 }
  0xc1   :  { %v434_v49 = vrot.slane %v167_v48, %v1913_v11 }
  0xc3   :  { %v439_v50 = vsel %vm339_vm0, %v438_v47, %v434_v49  ;;  %v200_v51 = vpop.xlane.xlu1 %199 }
  0xc4   :  { %v1947_v52 = vsel %vm480_vm3, %v439_v50, %v491_v40  ;;  %v547_v53 = vrot.slane %v200_v51, %v1910_v9  ;;  %v197_v54 = vpop.xlane.xlu0 %196 }
  0xc5   :  { %v543_v55 = vrot.slane %v197_v54, %v1913_v11 }
  0xc7   :  { %v548_v56 = vsel %vm339_vm0, %v547_v53, %v543_v55  ;;  %v206_v57 = vpop.xlane.xlu1 %205 }
  0xc8   :  { %v556_v58 = vrot.slane %v206_v57, %v1910_v9  ;;  %v203_v59 = vpop.xlane.xlu0 %202 }
  0xc9   :  { %v552_v60 = vrot.slane %v203_v59, %v1913_v11 }
  0xcb   :  { %v557_v61 = vsel %vm339_vm0, %v556_v58, %v552_v60  ;;  %v248_v62 = vpop.xlane.xlu1 %247 }
  0xcc   :  { %v1956_v63 = vsel %vm476_vm1, %v557_v61, %v548_v56  ;;  %v619_v0 = vrot.slane %v248_v62, %v1910_v9  ;;  %v245_v1 = vpop.xlane.xlu0 %244 }
  0xcd   :  { %v615_v2 = vrot.slane %v245_v1, %v1913_v11 }
  0xcf   :  { %v620_v3 = vsel %vm339_vm0, %v619_v0, %v615_v2  ;;  %v254_v4 = vpop.xlane.xlu1 %253 }
  0xd0   :  { %v628_v5 = vrot.slane %v254_v4, %v1910_v9  ;;  %v251_v6 = vpop.xlane.xlu0 %250 }
  0xd1   :  { %v624_v8 = vrot.slane %v251_v6, %v1913_v11 }
  0xd3   :  { %v629_v10 = vsel %vm339_vm0, %v628_v5, %v624_v8  ;;  %v128_v12 = vpop.xlane.xlu1 %127 }
  0xd4   :  { %v1965_v13 = vsel %vm476_vm1, %v629_v10, %v620_v3  ;;  %v125_v14 = vpop.xlane.xlu0 %124  ;;  %v375_v35 = vrot.slane %v128_v12, %v1910_v9 }
  0xd5   :  { %v371_v36 = vrot.slane %v125_v14, %v1913_v11 }
  0xd7   :  { %v176_v15 = vpop.xlane.xlu1 %175  ;;  %v376_v43 = vsel %vm339_vm0, %v375_v35, %v371_v36 }
  0xd8   :  { %v173_v16 = vpop.xlane.xlu0 %172  ;;  %v447_v44 = vrot.slane %v176_v15, %v1910_v9  ;;  %v483_v57 = vsel %vm482_vm4, %v376_v43, %v1941_v46 }
  0xd9   :  { %v443_v45 = vrot.slane %v173_v16, %v1913_v11 }
  0xdb   :  { %v1967_v17 = vpop.xlane.xlu1 %211  ;;  %v448_v59 = vsel %vm339_vm0, %v447_v44, %v443_v45 }
  0xdc   :  { %v1969_v18 = vpop.xlane.xlu0 %208  ;;  %v493_v5 = vsel %vm482_vm4, %v448_v59, %v1947_v52 }
  0xdf   :  { %v1971_v19 = vpop.xlane.xlu1 %259 }
  0xe0   :  { %v1973_v20 = vpop.xlane.xlu0 %256 }
  0xe3   :  { %v134_v21 = vpop.xlane.xlu1 %133 }
  0xe4   :  { %v131_v22 = vpop.xlane.xlu0 %130  ;;  %v384_v37 = vrot.slane %v134_v21, %v1910_v9 }
  0xe5   :  { %v380_v38 = vrot.slane %v131_v22, %v1913_v11 }
  0xe7   :  { %v182_v23 = vpop.xlane.xlu1 %181  ;;  %v385_v47 = vsel %vm339_vm0, %v384_v37, %v380_v38  ;;  %v637_v37 = vrot.slane %v1971_v19, %v1910_v9  ;;  %v633_v38 = vrot.slane %v1973_v20, %v1913_v11 }
  0xe8   :  { %v179_v24 = vpop.xlane.xlu0 %178  ;;  %v456_v48 = vrot.slane %v182_v23, %v1910_v9  ;;  %v485_v60 = vsel %vm484_vm5, %v385_v47, %v483_v57 }
  0xe9   :  { %v452_v49 = vrot.slane %v179_v24, %v1913_v11  ;;  %v565_v24 = vrot.slane %v1967_v17, %v1910_v9  ;;  %v638_v45 = vsel %vm339_vm0, %v637_v37, %v633_v38 }
  0xeb   :  { %v1975_v25 = vpop.xlane.xlu1 %217  ;;  %v457_v61 = vsel %vm339_vm0, %v456_v48, %v452_v49 }
  0xec   :  { %v1977_v26 = vpop.xlane.xlu0 %214  ;;  %v494_v10 = vsel %vm484_vm5, %v457_v61, %v493_v5  ;;  %v692_v61 = vsel %vm478_vm2, %v638_v45, %v1965_v13 }
  0xef   :  { %v1979_v27 = vpop.xlane.xlu1 %265 }
  0xf0   :  { %v1981_v28 = vpop.xlane.xlu0 %262 }
  0xf3   :  { %v140_v29 = vpop.xlane.xlu1 %139 }
  0xf4   :  { %v137_v30 = vpop.xlane.xlu0 %136  ;;  %v393_v40 = vrot.slane %v140_v29, %v1910_v9  ;;  %v561_v29 = vrot.slane %v1969_v18, %v1913_v11 }
  0xf5   :  { %v389_v41 = vrot.slane %v137_v30, %v1913_v11 }
  0xf6   :  { %v566_v36 = vsel %vm339_vm0, %v565_v24, %v561_v29 }
  0xf7   :  { %v188_v31 = vpop.xlane.xlu1 %187  ;;  %v394_v51 = vsel %vm339_vm0, %v393_v40, %v389_v41  ;;  %v685_v20 = vsel %vm478_vm2, %v566_v36, %v1956_v63 }
  0xf8   :  { %v185_v32 = vpop.xlane.xlu0 %184  ;;  %v465_v53 = vrot.slane %v188_v31, %v1910_v9  ;;  %v487_v1 = vsel %vm486_vm6, %v394_v51, %v485_v60  ;;  %v574_v31 = vrot.slane %v1975_v25, %v1910_v9 }
  0xf9   :  { %v461_v54 = vrot.slane %v185_v32, %v1913_v11  ;;  %v570_v32 = vrot.slane %v1977_v26, %v1913_v11 }
  0xfb   :  { %v1983_v33 = vpop.xlane.xlu1 %223  ;;  %v466_v2 = vsel %vm339_vm0, %v465_v53, %v461_v54  ;;  %v575_v41 = vsel %vm339_vm0, %v574_v31, %v570_v32 }
  0xfc   :  { %v1985_v34 = vpop.xlane.xlu0 %220  ;;  %v495_v15 = vsel %vm486_vm6, %v466_v2, %v494_v10  ;;  %v583_v17 = vrot.slane %v1983_v33, %v1910_v9  ;;  %v646_v33 = vrot.slane %v1979_v27, %v1910_v9 }
  0xfd   :  { %v579_v18 = vrot.slane %v1985_v34, %v1913_v11  ;;  %v642_v34 = vrot.slane %v1981_v28, %v1913_v11 }
  0xff   :  { %v1991_v39 = vpop.xlane.xlu1 %271  ;;  %v584_v47 = vsel %vm339_vm0, %v583_v17, %v579_v18 }
 0x100   :  { %v1995_v42 = vpop.xlane.xlu0 %268  ;;  %v655_v48 = vrot.slane %v1991_v39, %v1910_v9 }
 0x101   :  { %v651_v49 = vrot.slane %v1995_v42, %v1913_v11  ;;  %v647_v42 = vsel %vm339_vm0, %v646_v33, %v642_v34 }
 0x103   :  { %v146_v50 = vpop.xlane.xlu1 %145  ;;  %v656_v59 = vsel %vm339_vm0, %v655_v48, %v651_v49  ;;  %v2123_v48 = vsub.s32 1, %v1907_v7  ;;  %v2126_v49 = vsub.s32 0, %v1907_v7 }
 0x104   :  { %v402_v55 = vrot.slane %v146_v50, %v1910_v9  ;;  %v143_v56 = vpop.xlane.xlu0 %142  ;;  %v686_v50 = vsel %vm480_vm3, %v575_v41, %v685_v20 }
 0x105   :  { %v398_v58 = vrot.slane %v143_v56, %v1913_v11  ;;  %v687_v57 = vsel %vm482_vm4, %v584_v47, %v686_v50 }
 0x107   :  { %v194_v62 = vpop.xlane.xlu1 %193  ;;  %v403_v0 = vsel %vm339_vm0, %v402_v55, %v398_v58 }
 0x108   :  { %v474_v3 = vrot.slane %v194_v62, %v1910_v9  ;;  %v191_v46 = vpop.xlane.xlu0 %190  ;;  %v2018_v4 = vsel %vm488_vm7, %v403_v0, %v487_v1 }
 0x109   :  { %v470_v6 = vrot.slane %v191_v46, %v1913_v11  ;;  %v500_v8 = vsel %vm499_vm8, %v2018_v4, 0.0 }
 0x10a   :  { %501 = vadd.xlane.f32.xlu0 %v500_v8 }
 0x10b   :  { %v230_v12 = vpop.xlane.xlu1 %229  ;;  %v475_v14 = vsel %vm339_vm0, %v474_v3, %v470_v6  ;;  %v693_v3 = vsel %vm480_vm3, %v647_v42, %v692_v61 }
 0x10c   :  { %v227_v16 = vpop.xlane.xlu0 %226  ;;  %v2029_v21 = vsel %vm488_vm7, %v475_v14, %v495_v15  ;;  %v592_v25 = vrot.slane %v230_v12, %v1910_v9  ;;  %v694_v10 = vsel %vm482_vm4, %v656_v59, %v693_v3 }
 0x10d   :  { %v503_v52 = vsel %vm499_vm8, %v2029_v21, 0.0  ;;  %v588_v40 = vrot.slane %v227_v16, %v1913_v11 }
 0x10e   :  { %504 = vadd.xlane.f32.xlu1 %v503_v52 }
 0x10f   :  { %v278_v22 = vpop.xlane.xlu1 %277  ;;  %v593_v63 = vsel %vm339_vm0, %v592_v25, %v588_v40 }
 0x110   :  { %v275_v23 = vpop.xlane.xlu0 %274  ;;  %v664_v51 = vrot.slane %v278_v22, %v1910_v9  ;;  %v688_v60 = vsel %vm484_vm5, %v593_v63, %v687_v57  ;;  %v1705_v22 = vmov 0.0  }
 0x111   :  { %v660_v27 = vrot.slane %v275_v23, %v1913_v11  ;;  %1549 = vmatprep.subr.mxu0 %v1705_v22  ;;  %v291_v23 = vld [vmem:[%s2187_s1] sm:$0xff]  ;;  %1554 = vmatprep.subr.mxu1 %v1705_v22 }
 0x112   :  { %1550 = vmatpush3.msra.mxu0 %v291_v23  ;;  %1551 = vmatprep.mubr.msk.f32.mxu0 %vm1706_vm9, %v1705_v22 }
 0x113   :  { %v236_v30 = vpop.xlane.xlu1 %235  ;;  %v665_v62 = vsel %vm339_vm0, %v664_v51, %v660_v27  ;;  %1556 = vmatprep.mubr.msk.f32.mxu1 %vm1706_vm9, %v1705_v22  ;;  %v293_v27 = vld [vmem:[%s2189_s3] sm:$0xff] }
 0x114   :  { %v233_v35 = vpop.xlane.xlu0 %232  ;;  %v601_v43 = vrot.slane %v236_v30, %v1910_v9  ;;  %v695_v14 = vsel %vm484_vm5, %v665_v62, %v694_v10 }
 0x115   :  { %v597_v19 = vrot.slane %v233_v35, %v1913_v11 }
 0x117   :  { %v284_v26 = vpop.xlane.xlu1 %283  ;;  %v602_v28 = vsel %vm339_vm0, %v601_v43, %v597_v19 }
 0x118   :  { %v281_v44 = vpop.xlane.xlu0 %280  ;;  %v673_v54 = vrot.slane %v284_v26, %v1910_v9  ;;  %v689_v2 = vsel %vm486_vm6, %v602_v28, %v688_v60  ;;  %v292_v26 = vld [vmem:[%s2188_s2] sm:$0xf] }
 0x119   :  { %v669_v55 = vrot.slane %v281_v44, %v1913_v11  ;;  %1555 = vmatpush3.msk.msra.mxu1 %vm811_vm12, %v292_v26 }
 0x11a   :  { %1566 = vmatprep.subr.mxu1 %v1705_v22 }
 0x11b   :  { %v242_v53 = vpop.xlane.xlu1 %241  ;;  %v674_v46 = vsel %vm339_vm0, %v673_v54, %v669_v55  ;;  %v1707_v54 = vmov 0.0|0.0   ;;  %v295_v55 = vld [vmem:[%s2190_s4] sm:$0xf] }
 0x11c   :  { %v610_v39 = vrot.slane %v242_v53, %v1910_v9  ;;  %v239_v56 = vpop.xlane.xlu0 %238  ;;  %v696_v16 = vsel %vm486_vm6, %v674_v46, %v695_v14  ;;  %v294_v53 = vld [vmem:[%s2189_s3 + $0x8] sm:$0xff]  ;;  %1571 = vmatprep.subr.bf16.mxu0 %v1707_v54  ;;  %s1709_s3 = smov [#allocation5]  }
 0x11d   :  { %v606_v58 = vrot.slane %v239_v56, %v1913_v11  ;;  %v1572_v28 = vpack.c.bf16 %v294_v53, %v293_v27  ;;  %s1520_s4 = sshll.u32 %s1709_s3, 4  ;;  %s1521_s4 = int_to_ptr.vmem [resolvable:$true] %s1520_s4 }
 0x11e   :  { %s1676_s14 = scalar_lea.vmem %s1521_s4, 8192  ;;  %p1681_p9 = scmp.lt.s32.totalorder %s1521_s4, %s1521_s4 }
 0x11f   :  { %v290_v0 = vpop.xlane.xlu1 %289  ;;  %v611_v1 = vsel %vm339_vm0, %v610_v39, %v606_v58  ;;  %p1677_p8 = scmp.ne.s32.totalorder %s1521_s4, %s1676_s14  ;;  %p1682_p10 = scmp.lt.s32.totalorder %s1676_s14, %s1676_s14 }
 0x120   :  { %v682_v5 = vrot.slane %v290_v0, %v1910_v9  ;;  %v287_v6 = vpop.xlane.xlu0 %286  ;;  %v2089_v8 = vsel %vm488_vm7, %v611_v1, %v689_v2 }
 0x121   :  { %v678_v13 = vrot.slane %v287_v6, %v1913_v11  ;;  %v700_v12 = vsel %vm499_vm8, %v2089_v8, -inf  ;;  %p1683_p11 = por %p1682_p10, %p1681_p9 }
 0x122   :  { %701 = vmax.xlane.f32.xlu0 %v700_v12 }
 0x123   :  { %v683_v15 = vsel %vm339_vm0, %v682_v5, %v678_v13  ;;  %p1684_p12 = pnand %p1683_p11, %p1677_p8 }
 0x124   :  { %v2099_v9 = vsel %vm488_vm7, %v683_v15, %v696_v16 }
 0x125   :  { %v703_v52 = vsel %vm499_vm8, %v2099_v9, -inf }
 0x126   :  { %704 = vmax.xlane.f32.xlu1 %v703_v52 }
 0x197   :  { %v502_v29 = vpop.xlane.xlu0 %501 }
 0x198   :  { %v506_v31 = vmul.f32 0.00024414063, %v502_v29 }
 0x19a   :  { %v711_v37 = vrot.slane %v506_v31, %v1913_v11 }
 0x19b   :  { %v505_v24 = vpop.xlane.xlu1 %504 }
 0x19c   :  { %v507_v30 = vmul.f32 0.00024414063, %v505_v24 }
 0x19e   :  { %v715_v35 = vrot.slane %v507_v30, %v1913_v11 }
 0x1a0   :  { %v716_v25 = vsel %vm476_vm1, %v715_v35, %v711_v37 }
 0x1af   :  { %v702_v32 = vpop.xlane.xlu0 %701 }
 0x1b0   :  { %v723_v38 = vrot.slane %v702_v32, %v1913_v11 }
 0x1b3   :  { %v705_v36 = vpop.xlane.xlu1 %704 }
 0x1b4   :  { %v727_v17 = vrot.slane %v705_v36, %v1913_v11 }
 0x1b6   :  { %v728_v18 = vsel %vm480_vm3, %v727_v17, %v723_v38 }
 0x1b7   :  { %v731_v40 = vsel %vm730_vm10, %v716_v25, %v728_v18 }
 0x1b8   :  { %1552 = vmatmul.mubr.msk.f32.vlgmr.msra.gmra.mrb[0].mxu0 %vm732_vm11, %v731_v40 }
 0x1b9   :  { %1563 = vmatprep.mubr.msk.f32.mxu0 %vm1706_vm9, %v1705_v22  ;;  %1573 = vmatpush3.bf16.msra.mxu0 %v1572_v28 }
 0x28b   :  { %v802_v11 = vpop.f32.mrb[0].mxu0 }
 0x28c   :  { %v806_v41 = vmax.f32 %v802_v11, 0.0  ;;  %v1553_v43 = vpop.f32.mrb[1].mxu0 }
 0x28e   :  { %1557 = vmatmul.mubr.msk.f32.vlgmr.msra.gmra.mrb[0].mxu1 %vm807_vm13, %v806_v41 }
 0x28f   :  { %1568 = vmatprep.mubr.msk.f32.mxu1 %vm1706_vm9, %v1705_v22  ;;  %1567 = vmatpush3.msk.msra.mxu1 %vm811_vm12, %v295_v55  ;;  %v1171_v55 = vsub.s32 2, %v1907_v7 }
 0x361   :  { %v881_v19 = vpop.f32.mrb[0].mxu1 }
 0x362   :  { %v886_v44 = vrot.slane %v881_v19, 2  ;;  %v1558_v20 = vpop.f32.mrb[1].mxu1 }
 0x364   :  { %v888_v33 = vadd.f32 %v886_v44, %v881_v19 }
 0x366   :  { %v1535_v34 = vmul.f32 -1.442695, %v888_v33  ;;  %v1708_v33 = vmov 1966171168  }
 0x368   :  { %1582 = vpow2.f32 %v1535_v34  ;;  %v1114_v34 = vunpack.c.l.s4 %v1708_v33 }
 0x372   :  { %v1583_v45 = vpop.eup %1582 }
 0x373   :  { %v892_v47 = vadd.f32 1.0, %v1583_v45  ;;  %v1115_v45 = vunpack.c.0.s8 %v1114_v34  ;;  %v1598_v34 = vld [vmem:[#allocation2 + $0x60] sm:$0xff] }
 0x375   :  { %1584 = vrcp.f32 %v892_v47  ;;  %v1118_v47 = vsub.s32 %v1115_v45, %v1907_v7 }
 0x37f   :  { %v1585_v50 = vpop.eup %1584 }
 0x380   :  { %v905_v63 = vrot.slane %v1585_v50, %v2123_v48  ;;  %v898_v51 = vrot.slane %v1585_v50, %v2126_v49 }
 0x382   :  { %907 = vbcast.lane.b32.xlu1 %v905_v63, 256  ;;  %900 = vbcast.lane.b32.xlu0 %v898_v51, 256 }
 0x3f4   :  { %v2140_v39 = vpop.permute.xlu1 %907  ;;  %v901_v56 = vpop.permute.xlu0 %900 }
 0x3f5   :  { %v910_v42 = vmul.f32 %v2140_v39, %v2029_v21  ;;  %v928_v57 = vmul.f32 %v2140_v39, %v2099_v9  ;;  %v909_v58 = vmul.f32 %v901_v56, %v2018_v4  ;;  %v927_v59 = vmul.f32 %v901_v56, %v2089_v8 }
 0x3f7   :  { %v918_v60 = vsel %vm499_vm8, %v910_v42, 0.0  ;;  %v936_v61 = vsel %vm499_vm8, %v928_v57, -inf  ;;  %v911_v62 = vsel %vm499_vm8, %v909_v58, 0.0  ;;  %v929_v0 = vsel %vm499_vm8, %v927_v59, -inf }
 0x3f8   :  { %v919_v1 = vrot.slane %v918_v60, 4  ;;  %v937_v2 = vrot.slane %v936_v61, 4  ;;  %v912_v3 = vrot.slane %v911_v62, 4  ;;  %v930_v46 = vrot.slane %v929_v0, 4 }
 0x3f9   :  { %v1182_v57 = vsub.s32 3, %v1907_v7  ;;  %v1193_v59 = vsub.s32 4, %v1907_v7 }
 0x3fa   :  { %v920_v21 = vadd.f32 %v919_v1, %v918_v60  ;;  %v938_v5 = vmax.f32 %v936_v61, %v937_v2  ;;  %v913_v6 = vadd.f32 %v912_v3, %v911_v62  ;;  %v931_v10 = vmax.f32 %v929_v0, %v930_v46 }
 0x3fb   :  { %v1204_v61 = vsub.s32 5, %v1907_v7  ;;  %v1215_v1 = vsub.s32 6, %v1907_v7  ;;  %v1226_v46 = vsub.s32 7, %v1907_v7 }
 0x3fc   :  { %v921_v13 = vrot.slane %v920_v21, 2  ;;  %v939_v4 = vrot.slane %v938_v5, 2  ;;  %v914_v12 = vrot.slane %v913_v6, 2  ;;  %v932_v8 = vrot.slane %v931_v10, 2 }
 0x3fe   :  { %v922_v14 = vadd.f32 %v921_v13, %v920_v21  ;;  %v940_v15 = vmax.f32 %v938_v5, %v939_v4  ;;  %v915_v16 = vadd.f32 %v914_v12, %v913_v6  ;;  %v933_v9 = vmax.f32 %v931_v10, %v932_v8 }
 0x400   :  { %v923_v52 = vrot.slane %v922_v14, 1  ;;  %v941_v22 = vrot.slane %v940_v15, 1  ;;  %v916_v23 = vrot.slane %v915_v16, 1  ;;  %v934_v24 = vrot.slane %v933_v9, 1 }
 0x402   :  { %v924_v29 = vadd.f32 %v923_v52, %v922_v14  ;;  %v942_v30 = vmax.f32 %v940_v15, %v941_v22  ;;  %v917_v31 = vadd.f32 %v916_v23, %v915_v16  ;;  %v935_v32 = vmax.f32 %v933_v9, %v934_v24  ;;  %v1590_v14 = vld [vmem:[#allocation2 + $0x20] sm:$0xff]  ;;  %v1591_v16 = vld [vmem:[#allocation2 + $0x28] sm:$0xff] }
 0x403   :  { %v1592_v52 = vld [vmem:[#allocation2] sm:$0xff]  ;;  %v1593_v23 = vld [vmem:[#allocation2 + $0x8] sm:$0xff] }
 0x404   :  { %v926_v35 = vmul.f32 0.00048828125, %v924_v29  ;;  %v925_v36 = vmul.f32 0.00048828125, %v917_v31  ;;  %v949_v38 = vsel %vm480_vm3, %v942_v30, %v935_v32 }
 0x406   :  { %v945_v37 = vsel %vm476_vm1, %v926_v35, %v925_v36 }
 0x407   :  { %v951_v17 = vsel %vm730_vm10, %v945_v37, %v949_v38  ;;  %v1594_v37 = vld [vmem:[#allocation2 + $0x40] sm:$0xff] }
 0x408   :  { %1564 = vmatmul.mubr.msk.f32.vlgmr.msra.gmra.mrb[2].mxu0 %vm499_vm8, %v951_v17  ;;  %v1595_v17 = vld [vmem:[#allocation2 + $0x48] sm:$0xff] }
 0x4db   :  { %v1021_v18 = vpop.f32.mrb[2].mxu0 }
 0x4dc   :  { %v1025_v25 = vmax.f32 %v1021_v18, 0.0  ;;  %v1565_v40 = vpop.f32.mrb[3].mxu0 }
 0x4de   :  { %1569 = vmatmul.mubr.msk.f32.vlgmr.msra.gmra.mrb[2].mxu1 %vm807_vm13, %v1025_v25  ;;  %v1596_v25 = vld [vmem:[#allocation2 + $0x10] sm:$0xff] }
 0x5b1   :  { %v1098_v26 = vpop.f32.mrb[2].mxu1 }
 0x5b2   :  { %v1103_v11 = vrot.slane %v1098_v26, 2  ;;  %v1570_v41 = vpop.f32.mrb[3].mxu1 }
 0x5b4   :  { %v1105_v43 = vadd.f32 %v1103_v11, %v1098_v26  ;;  %v1597_v26 = vld [vmem:[#allocation2 + $0x18] sm:$0xff] }
 0x5b6   :  { %v1539_v19 = vmul.f32 -1.442695, %v1105_v43 }
 0x5b8   :  { %1586 = vpow2.f32 %v1539_v19 }
 0x5c2   :  { %v1587_v44 = vpop.eup %1586 }
 0x5c3   :  { %v1109_v20 = vadd.f32 1.0, %v1587_v44 }
 0x5c5   :  { %1588 = vrcp.f32 %v1109_v20 }
 0x5cf   :  { %v1589_v50 = vpop.eup %1588 }
 0x5d0   :  { %v1119_v63 = vrot.slane %v1589_v50, %v1118_v47 }
 0x5d2   :  { %v1127_v51 = vrot.slane %v1119_v63, %v1118_v47  ;;  %v1120_v60 = vcombine.high %v1119_v63, %v1119_v63  ;;  %v1600_v63 = vld [vmem:[#allocation2 + $0x30] sm:$0xff] }
 0x5d4   :  { %v1138_v27 = vrot.slane %v1127_v51, %v2126_v49  ;;  %v1134_v62 = vrot.slane %v1120_v60, %v1118_v47  ;;  %v1599_v47 = vld [vmem:[#allocation2 + $0x68] sm:$0xff] }
 0x5d6   :  { %v1145_v53 = vmul.f32 %v1138_v27, %v901_v56  ;;  %v1142_v2 = vrot.slane %v1134_v62, %v2126_v49  ;;  %v1601_v27 = vld [vmem:[#allocation2 + $0x38] sm:$0xff]  ;;  %v1604_v62 = vld [vmem:[#allocation2 + $0x50] sm:$0xff] }
 0x5d8   :  { %v1161_v28 = vrot.slane %v1145_v53, %v2123_v48  ;;  %v1150_v54 = vrot.slane %v1145_v53, %v2126_v49  ;;  %v1172_v42 = vrot.slane %v1145_v53, %v1171_v55  ;;  %v1183_v58 = vrot.slane %v1145_v53, %v1182_v57 }
 0x5d9   :  { %v1194_v56 = vrot.slane %v1145_v53, %v1193_v59  ;;  %v1205_v0 = vrot.slane %v1145_v53, %v1204_v61  ;;  %v1216_v3 = vrot.slane %v1145_v53, %v1215_v1  ;;  %v1146_v21 = vmul.f32 %v1142_v2, %v2140_v39 }
 0x5da   :  { %1163 = vbcast.lane.b32.xlu0 %v1161_v28, 256  ;;  %1152 = vbcast.lane.b32.xlu1 %v1150_v54, 256  ;;  %v1227_v5 = vrot.slane %v1145_v53, %v1226_v46 }
 0x5db   :  { %v1238_v6 = vrot.slane %v1146_v21, %v2126_v49  ;;  %v1249_v10 = vrot.slane %v1146_v21, %v2123_v48  ;;  %v1260_v13 = vrot.slane %v1146_v21, %v1171_v55  ;;  %v1271_v4 = vrot.slane %v1146_v21, %v1182_v57 }
 0x5dc   :  { %v1282_v7 = vrot.slane %v1146_v21, %v1193_v59  ;;  %v1293_v39 = vrot.slane %v1146_v21, %v1204_v61  ;;  %v1304_v12 = vrot.slane %v1146_v21, %v1215_v1  ;;  %v1315_v49 = vrot.slane %v1146_v21, %v1226_v46  ;;  %v1602_v59 = vld [vmem:[#allocation2 + $0x80] sm:$0xff]  ;;  %v1605_v1 = vld [vmem:[#allocation2 + $0x58] sm:$0xff] }
 0x5de   :  { %1174 = vbcast.lane.b32.xlu0 %v1172_v42, 256  ;;  %1156 = vbcast.lane.b32.xlu1 %v1150_v54, 264 }
 0x5e2   :  { %1185 = vbcast.lane.b32.xlu0 %v1183_v58, 256  ;;  %1167 = vbcast.lane.b32.xlu1 %v1161_v28, 264 }
 0x5e6   :  { %1196 = vbcast.lane.b32.xlu0 %v1194_v56, 256  ;;  %1178 = vbcast.lane.b32.xlu1 %v1172_v42, 264 }
 0x5ea   :  { %1207 = vbcast.lane.b32.xlu0 %v1205_v0, 256  ;;  %1189 = vbcast.lane.b32.xlu1 %v1183_v58, 264 }
 0x5ee   :  { %1218 = vbcast.lane.b32.xlu0 %v1216_v3, 256  ;;  %1200 = vbcast.lane.b32.xlu1 %v1194_v56, 264  ;;  %v1603_v56 = vld [vmem:[#allocation2 + $0x88] sm:$0xff] }
 0x5f2   :  { %1229 = vbcast.lane.b32.xlu0 %v1227_v5, 256  ;;  %1211 = vbcast.lane.b32.xlu1 %v1205_v0, 264 }
 0x5f6   :  { %1222 = vbcast.lane.b32.xlu1 %v1216_v3, 264  ;;  %1240 = vbcast.lane.b32.xlu0 %v1238_v6, 256 }
 0x5fa   :  { %1233 = vbcast.lane.b32.xlu1 %v1227_v5, 264  ;;  %1251 = vbcast.lane.b32.xlu0 %v1249_v10, 256 }
 0x5fe   :  { %1244 = vbcast.lane.b32.xlu1 %v1238_v6, 264  ;;  %1262 = vbcast.lane.b32.xlu0 %v1260_v13, 256 }
 0x602   :  { %1255 = vbcast.lane.b32.xlu1 %v1249_v10, 264  ;;  %1273 = vbcast.lane.b32.xlu0 %v1271_v4, 256 }
 0x606   :  { %1266 = vbcast.lane.b32.xlu1 %v1260_v13, 264  ;;  %1284 = vbcast.lane.b32.xlu0 %v1282_v7, 256  ;;  %v1606_v13 = vld [vmem:[#allocation2 + $0xa0] sm:$0xff] }
 0x60a   :  { %1277 = vbcast.lane.b32.xlu1 %v1271_v4, 264  ;;  %1295 = vbcast.lane.b32.xlu0 %v1293_v39, 256 }
 0x60e   :  { %1288 = vbcast.lane.b32.xlu1 %v1282_v7, 264  ;;  %1306 = vbcast.lane.b32.xlu0 %v1304_v12, 256  ;;  %v1607_v7 = vld [vmem:[#allocation2 + $0xa8] sm:$0xff] }
 0x612   :  { %1299 = vbcast.lane.b32.xlu1 %v1293_v39, 264  ;;  %1317 = vbcast.lane.b32.xlu0 %v1315_v49, 256 }
 0x616   :  { %1310 = vbcast.lane.b32.xlu1 %v1304_v12, 264  ;;  %v1608_v12 = vld [vmem:[#allocation2 + $0x70] sm:$0xff] }
 0x61a   :  { %1321 = vbcast.lane.b32.xlu1 %v1315_v49, 264 }
 0x64c   :  { %v1164_v48 = vpop.permute.xlu0 %1163  ;;  %v1153_v8 = vpop.permute.xlu1 %1152 }
 0x64d   :  { %v1327_v15 = vmul.f32 %v1590_v14, %v1164_v48  ;;  %v1328_v9 = vmul.f32 %v1591_v16, %v1164_v48  ;;  %v1323_v22 = vmul.f32 %v1592_v52, %v1153_v8  ;;  %v1324_v24 = vmul.f32 %v1593_v23, %v1153_v8  ;;  %v1609_v48 = vld [vmem:[#allocation2 + $0x78] sm:$0xff]  ;;  %v1610_v23 = vld [vmem:[#allocation2 + $0xc0] sm:$0xff] }
 0x64f   :  { %v1391_v29 = vmax.f32 %v1327_v15, 0.0  ;;  %v1392_v30 = vmax.f32 %v1328_v9, 0.0  ;;  %v1387_v31 = vmax.f32 %v1323_v22, 0.0  ;;  %v1388_v32 = vmax.f32 %v1324_v24, 0.0 }
 0x650   :  { %v1175_v35 = vpop.permute.xlu0 %1174  ;;  %v1157_v36 = vpop.permute.xlu1 %1156 }
 0x651   :  { %1455 = vst [vmem:[#allocation5 + $0x20] sm:$0xff] %v1391_v29  ;;  %1456 = vst [vmem:[#allocation5 + $0x28] sm:$0xff] %v1392_v30  ;;  %v1331_v38 = vmul.f32 %v1594_v37, %v1175_v35  ;;  %v1332_v18 = vmul.f32 %v1595_v17, %v1175_v35  ;;  %v1325_v40 = vmul.f32 %v1596_v25, %v1157_v36  ;;  %v1611_v29 = vld [vmem:[#allocation2 + $0xc8] sm:$0xff]  ;;  %v1613_v35 = vld [vmem:[#allocation2 + $0x98] sm:$0xff] }
 0x652   :  { %1451 = vst [vmem:[#allocation5] sm:$0xff] %v1387_v31  ;;  %1452 = vst [vmem:[#allocation5 + $0x8] sm:$0xff] %v1388_v32  ;;  %v1326_v11 = vmul.f32 %v1597_v26, %v1157_v36  ;;  %v1612_v31 = vld [vmem:[#allocation2 + $0x90] sm:$0xff]  ;;  %v1614_v26 = vld [vmem:[#allocation2 + $0xe0] sm:$0xff] }
 0x653   :  { %v1395_v41 = vmax.f32 %v1331_v38, 0.0  ;;  %v1396_v43 = vmax.f32 %v1332_v18, 0.0  ;;  %v1389_v19 = vmax.f32 %v1325_v40, 0.0 }
 0x654   :  { %v1390_v44 = vmax.f32 %v1326_v11, 0.0  ;;  %v1186_v20 = vpop.permute.xlu0 %1185  ;;  %v1168_v33 = vpop.permute.xlu1 %1167 }
 0x655   :  { %1459 = vst [vmem:[#allocation5 + $0x40] sm:$0xff] %v1395_v41  ;;  %1460 = vst [vmem:[#allocation5 + $0x48] sm:$0xff] %v1396_v43  ;;  %v1335_v45 = vmul.f32 %v1598_v34, %v1186_v20  ;;  %v1336_v50 = vmul.f32 %v1599_v47, %v1186_v20  ;;  %v1329_v51 = vmul.f32 %v1600_v63, %v1168_v33  ;;  %v1615_v41 = vld [vmem:[#allocation2 + $0xe8] sm:$0xff]  ;;  %v1617_v20 = vld [vmem:[#allocation2 + $0xb8] sm:$0xff] }
 0x656   :  { %1453 = vst [vmem:[#allocation5 + $0x10] sm:$0xff] %v1389_v19  ;;  %1454 = vst [vmem:[#allocation5 + $0x18] sm:$0xff] %v1390_v44  ;;  %v1330_v53 = vmul.f32 %v1601_v27, %v1168_v33  ;;  %v1616_v19 = vld [vmem:[#allocation2 + $0xb0] sm:$0xff] }
 0x657   :  { %v1399_v28 = vmax.f32 %v1335_v45, 0.0  ;;  %v1400_v54 = vmax.f32 %v1336_v50, 0.0  ;;  %v1393_v55 = vmax.f32 %v1329_v51, 0.0  ;;  %v1618_v27 = vld [vmem:[#allocation2 + $0xd0] sm:$0xff] }
 0x658   :  { %v1394_v42 = vmax.f32 %v1330_v53, 0.0  ;;  %v1197_v57 = vpop.permute.xlu0 %1196  ;;  %v1179_v58 = vpop.permute.xlu1 %1178 }
 0x659   :  { %1463 = vst [vmem:[#allocation5 + $0x60] sm:$0xff] %v1399_v28  ;;  %1464 = vst [vmem:[#allocation5 + $0x68] sm:$0xff] %v1400_v54  ;;  %v1339_v60 = vmul.f32 %v1602_v59, %v1197_v57  ;;  %v1340_v61 = vmul.f32 %v1603_v56, %v1197_v57  ;;  %v1333_v0 = vmul.f32 %v1604_v62, %v1179_v58  ;;  %v1619_v28 = vld [vmem:[#allocation2 + $0xd8] sm:$0xff]  ;;  %v1621_v57 = vld [vmem:[#allocation2 + $0x108] sm:$0xff] }
 0x65a   :  { %1457 = vst [vmem:[#allocation5 + $0x30] sm:$0xff] %v1393_v55  ;;  %1458 = vst [vmem:[#allocation5 + $0x38] sm:$0xff] %v1394_v42  ;;  %v1334_v2 = vmul.f32 %v1605_v1, %v1179_v58  ;;  %v1620_v55 = vld [vmem:[#allocation2 + $0x100] sm:$0xff]  ;;  %v1622_v1 = vld [vmem:[#allocation2 + $0xf0] sm:$0xff] }
 0x65b   :  { %v1403_v3 = vmax.f32 %v1339_v60, 0.0  ;;  %v1404_v46 = vmax.f32 %v1340_v61, 0.0  ;;  %v1397_v21 = vmax.f32 %v1333_v0, 0.0 }
 0x65c   :  { %v1398_v5 = vmax.f32 %v1334_v2, 0.0  ;;  %v1208_v6 = vpop.permute.xlu0 %1207  ;;  %v1190_v10 = vpop.permute.xlu1 %1189 }
 0x65d   :  { %1467 = vst [vmem:[#allocation5 + $0x80] sm:$0xff] %v1403_v3  ;;  %1468 = vst [vmem:[#allocation5 + $0x88] sm:$0xff] %v1404_v46  ;;  %v1343_v4 = vmul.f32 %v1606_v13, %v1208_v6  ;;  %v1344_v39 = vmul.f32 %v1607_v7, %v1208_v6  ;;  %v1337_v49 = vmul.f32 %v1608_v12, %v1190_v10  ;;  %v1623_v3 = vld [vmem:[#allocation2 + $0xf8] sm:$0xff]  ;;  %v1625_v6 = vld [vmem:[#allocation2 + $0x128] sm:$0xff] }
 0x65e   :  { %1461 = vst [vmem:[#allocation5 + $0x50] sm:$0xff] %v1397_v21  ;;  %1462 = vst [vmem:[#allocation5 + $0x58] sm:$0xff] %v1398_v5  ;;  %v1338_v8 = vmul.f32 %v1609_v48, %v1190_v10  ;;  %v1624_v21 = vld [vmem:[#allocation2 + $0x120] sm:$0xff]  ;;  %v1626_v48 = vld [vmem:[#allocation2 + $0x110] sm:$0xff] }
 0x65f   :  { %v1407_v14 = vmax.f32 %v1343_v4, 0.0  ;;  %v1408_v15 = vmax.f32 %v1344_v39, 0.0  ;;  %v1401_v16 = vmax.f32 %v1337_v49, 0.0 }
 0x660   :  { %v1402_v9 = vmax.f32 %v1338_v8, 0.0  ;;  %v1219_v52 = vpop.permute.xlu0 %1218  ;;  %v1201_v22 = vpop.permute.xlu1 %1200 }
 0x661   :  { %1471 = vst [vmem:[#allocation5 + $0xa0] sm:$0xff] %v1407_v14  ;;  %1472 = vst [vmem:[#allocation5 + $0xa8] sm:$0xff] %v1408_v15  ;;  %v1347_v24 = vmul.f32 %v1610_v23, %v1219_v52  ;;  %v1348_v30 = vmul.f32 %v1611_v29, %v1219_v52  ;;  %v1341_v32 = vmul.f32 %v1612_v31, %v1201_v22  ;;  %v1627_v14 = vld [vmem:[#allocation2 + $0x118] sm:$0xff]  ;;  %v1629_v52 = vld [vmem:[#allocation2 + $0x148] sm:$0xff] }
 0x662   :  { %1465 = vst [vmem:[#allocation5 + $0x70] sm:$0xff] %v1401_v16  ;;  %1466 = vst [vmem:[#allocation5 + $0x78] sm:$0xff] %v1402_v9  ;;  %v1342_v36 = vmul.f32 %v1613_v35, %v1201_v22  ;;  %v1628_v16 = vld [vmem:[#allocation2 + $0x140] sm:$0xff]  ;;  %v1630_v35 = vld [vmem:[#allocation2 + $0x130] sm:$0xff] }
 0x663   :  { %v1411_v37 = vmax.f32 %v1347_v24, 0.0  ;;  %v1412_v38 = vmax.f32 %v1348_v30, 0.0  ;;  %v1405_v17 = vmax.f32 %v1341_v32, 0.0 }
 0x664   :  { %v1406_v18 = vmax.f32 %v1342_v36, 0.0  ;;  %v1230_v25 = vpop.permute.xlu0 %1229  ;;  %v1212_v40 = vpop.permute.xlu1 %1211 }
 0x665   :  { %1475 = vst [vmem:[#allocation5 + $0xc0] sm:$0xff] %v1411_v37  ;;  %1476 = vst [vmem:[#allocation5 + $0xc8] sm:$0xff] %v1412_v38  ;;  %v1351_v11 = vmul.f32 %v1614_v26, %v1230_v25  ;;  %v1352_v43 = vmul.f32 %v1615_v41, %v1230_v25  ;;  %v1345_v44 = vmul.f32 %v1616_v19, %v1212_v40  ;;  %v1631_v37 = vld [vmem:[#allocation2 + $0x138] sm:$0xff]  ;;  %v1633_v25 = vld [vmem:[#allocation2 + $0x168] sm:$0xff] }
 0x666   :  { %1469 = vst [vmem:[#allocation5 + $0x90] sm:$0xff] %v1405_v17  ;;  %1470 = vst [vmem:[#allocation5 + $0x98] sm:$0xff] %v1406_v18  ;;  %v1346_v33 = vmul.f32 %v1617_v20, %v1212_v40  ;;  %v1632_v17 = vld [vmem:[#allocation2 + $0x160] sm:$0xff]  ;;  %v1634_v20 = vld [vmem:[#allocation2 + $0x150] sm:$0xff] }
 0x667   :  { %v1415_v34 = vmax.f32 %v1351_v11, 0.0  ;;  %v1416_v45 = vmax.f32 %v1352_v43, 0.0  ;;  %v1409_v47 = vmax.f32 %v1345_v44, 0.0 }
 0x668   :  { %v1410_v50 = vmax.f32 %v1346_v33, 0.0  ;;  %v1223_v63 = vpop.permute.xlu1 %1222  ;;  %v1241_v51 = vpop.permute.xlu0 %1240 }
 0x669   :  { %1479 = vst [vmem:[#allocation5 + $0xe0] sm:$0xff] %v1415_v34  ;;  %1480 = vst [vmem:[#allocation5 + $0xe8] sm:$0xff] %v1416_v45  ;;  %v1349_v53 = vmul.f32 %v1618_v27, %v1223_v63  ;;  %v1350_v54 = vmul.f32 %v1619_v28, %v1223_v63  ;;  %v1355_v42 = vmul.f32 %v1620_v55, %v1241_v51  ;;  %v1635_v34 = vld [vmem:[#allocation2 + $0x158] sm:$0xff]  ;;  %v1637_v63 = vld [vmem:[#allocation2 + $0x188] sm:$0xff] }
 0x66a   :  { %1473 = vst [vmem:[#allocation5 + $0xb0] sm:$0xff] %v1409_v47  ;;  %1474 = vst [vmem:[#allocation5 + $0xb8] sm:$0xff] %v1410_v50  ;;  %v1356_v58 = vmul.f32 %v1621_v57, %v1241_v51  ;;  %v1636_v47 = vld [vmem:[#allocation2 + $0x180] sm:$0xff]  ;;  %v1638_v57 = vld [vmem:[#allocation2 + $0x170] sm:$0xff] }
 0x66b   :  { %v1413_v59 = vmax.f32 %v1349_v53, 0.0  ;;  %v1414_v60 = vmax.f32 %v1350_v54, 0.0  ;;  %v1419_v56 = vmax.f32 %v1355_v42, 0.0 }
 0x66c   :  { %v1420_v61 = vmax.f32 %v1356_v58, 0.0  ;;  %v1234_v62 = vpop.permute.xlu1 %1233  ;;  %v1252_v0 = vpop.permute.xlu0 %1251 }
 0x66d   :  { %1477 = vst [vmem:[#allocation5 + $0xd0] sm:$0xff] %v1413_v59  ;;  %1478 = vst [vmem:[#allocation5 + $0xd8] sm:$0xff] %v1414_v60  ;;  %v1353_v2 = vmul.f32 %v1622_v1, %v1234_v62  ;;  %v1354_v46 = vmul.f32 %v1623_v3, %v1234_v62  ;;  %v1359_v5 = vmul.f32 %v1624_v21, %v1252_v0  ;;  %v1639_v59 = vld [vmem:[#allocation2 + $0x178] sm:$0xff]  ;;  %v1641_v62 = vld [vmem:[#allocation2 + $0x1a8] sm:$0xff] }
 0x66e   :  { %1483 = vst [vmem:[#allocation5 + $0x100] sm:$0xff] %v1419_v56  ;;  %1484 = vst [vmem:[#allocation5 + $0x108] sm:$0xff] %v1420_v61  ;;  %v1360_v10 = vmul.f32 %v1625_v6, %v1252_v0  ;;  %v1640_v56 = vld [vmem:[#allocation2 + $0x1a0] sm:$0xff]  ;;  %v1642_v6 = vld [vmem:[#allocation2 + $0x190] sm:$0xff] }
 0x66f   :  { %v1417_v13 = vmax.f32 %v1353_v2, 0.0  ;;  %v1418_v4 = vmax.f32 %v1354_v46, 0.0  ;;  %v1423_v7 = vmax.f32 %v1359_v5, 0.0 }
 0x670   :  { %v1424_v39 = vmax.f32 %v1360_v10, 0.0  ;;  %v1245_v12 = vpop.permute.xlu1 %1244  ;;  %v1263_v49 = vpop.permute.xlu0 %1262 }
 0x671   :  { %1481 = vst [vmem:[#allocation5 + $0xf0] sm:$0xff] %v1417_v13  ;;  %1482 = vst [vmem:[#allocation5 + $0xf8] sm:$0xff] %v1418_v4  ;;  %v1357_v8 = vmul.f32 %v1626_v48, %v1245_v12  ;;  %v1358_v15 = vmul.f32 %v1627_v14, %v1245_v12  ;;  %v1363_v9 = vmul.f32 %v1628_v16, %v1263_v49  ;;  %v1643_v13 = vld [vmem:[#allocation2 + $0x198] sm:$0xff]  ;;  %v1645_v12 = vld [vmem:[#allocation2 + $0x1c8] sm:$0xff] }
 0x672   :  { %1487 = vst [vmem:[#allocation5 + $0x120] sm:$0xff] %v1423_v7  ;;  %1488 = vst [vmem:[#allocation5 + $0x128] sm:$0xff] %v1424_v39  ;;  %v1364_v22 = vmul.f32 %v1629_v52, %v1263_v49  ;;  %v1644_v7 = vld [vmem:[#allocation2 + $0x1c0] sm:$0xff]  ;;  %v1646_v52 = vld [vmem:[#allocation2 + $0x1b0] sm:$0xff] }
 0x673   :  { %v1421_v23 = vmax.f32 %v1357_v8, 0.0  ;;  %v1422_v24 = vmax.f32 %v1358_v15, 0.0  ;;  %v1427_v29 = vmax.f32 %v1363_v9, 0.0 }
 0x674   :  { %v1428_v30 = vmax.f32 %v1364_v22, 0.0  ;;  %v1256_v31 = vpop.permute.xlu1 %1255  ;;  %v1274_v32 = vpop.permute.xlu0 %1273 }
 0x675   :  { %1485 = vst [vmem:[#allocation5 + $0x110] sm:$0xff] %v1421_v23  ;;  %1486 = vst [vmem:[#allocation5 + $0x118] sm:$0xff] %v1422_v24  ;;  %v1361_v36 = vmul.f32 %v1630_v35, %v1256_v31  ;;  %v1362_v38 = vmul.f32 %v1631_v37, %v1256_v31  ;;  %v1367_v18 = vmul.f32 %v1632_v17, %v1274_v32  ;;  %v1647_v23 = vld [vmem:[#allocation2 + $0x1b8] sm:$0xff]  ;;  %v1649_v31 = vld [vmem:[#allocation2 + $0x1e8] sm:$0xff] }
 0x676   :  { %1491 = vst [vmem:[#allocation5 + $0x140] sm:$0xff] %v1427_v29  ;;  %1492 = vst [vmem:[#allocation5 + $0x148] sm:$0xff] %v1428_v30  ;;  %v1368_v40 = vmul.f32 %v1633_v25, %v1274_v32  ;;  %v1648_v29 = vld [vmem:[#allocation2 + $0x1e0] sm:$0xff] }
 0x677   :  { %v1425_v26 = vmax.f32 %v1361_v36, 0.0  ;;  %v1426_v11 = vmax.f32 %v1362_v38, 0.0  ;;  %v1431_v41 = vmax.f32 %v1367_v18, 0.0  ;;  %v1650_v18 = vld [vmem:[#allocation2 + $0x1d0] sm:$0xff] }
 0x678   :  { %v1432_v43 = vmax.f32 %v1368_v40, 0.0  ;;  %v1267_v19 = vpop.permute.xlu1 %1266  ;;  %v1285_v44 = vpop.permute.xlu0 %1284  ;;  %v1651_v40 = vld [vmem:[#allocation2 + $0x1d8] sm:$0xff] }
 0x679   :  { %1489 = vst [vmem:[#allocation5 + $0x130] sm:$0xff] %v1425_v26  ;;  %1490 = vst [vmem:[#allocation5 + $0x138] sm:$0xff] %v1426_v11  ;;  %v1365_v33 = vmul.f32 %v1634_v20, %v1267_v19  ;;  %v1366_v45 = vmul.f32 %v1635_v34, %v1267_v19  ;;  %v1371_v50 = vmul.f32 %v1636_v47, %v1285_v44  ;;  %v1652_v19 = vld [vmem:[#allocation2 + $0x1f0] sm:$0xff]  ;;  %v1653_v20 = vld [vmem:[#allocation2 + $0x1f8] sm:$0xff] }
 0x67a   :  { %1495 = vst [vmem:[#allocation5 + $0x160] sm:$0xff] %v1431_v41  ;;  %1496 = vst [vmem:[#allocation5 + $0x168] sm:$0xff] %v1432_v43  ;;  %v1372_v51 = vmul.f32 %v1637_v63, %v1285_v44 }
 0x67b   :  { %v1429_v27 = vmax.f32 %v1365_v33, 0.0  ;;  %v1430_v53 = vmax.f32 %v1366_v45, 0.0  ;;  %v1435_v28 = vmax.f32 %v1371_v50, 0.0 }
 0x67c   :  { %v1436_v54 = vmax.f32 %v1372_v51, 0.0  ;;  %v1278_v55 = vpop.permute.xlu1 %1277  ;;  %v1296_v42 = vpop.permute.xlu0 %1295 }
 0x67d   :  { %1493 = vst [vmem:[#allocation5 + $0x150] sm:$0xff] %v1429_v27  ;;  %1494 = vst [vmem:[#allocation5 + $0x158] sm:$0xff] %v1430_v53  ;;  %v1369_v58 = vmul.f32 %v1638_v57, %v1278_v55  ;;  %v1370_v60 = vmul.f32 %v1639_v59, %v1278_v55  ;;  %v1375_v61 = vmul.f32 %v1640_v56, %v1296_v42 }
 0x67e   :  { %1499 = vst [vmem:[#allocation5 + $0x180] sm:$0xff] %v1435_v28  ;;  %1500 = vst [vmem:[#allocation5 + $0x188] sm:$0xff] %v1436_v54  ;;  %v1376_v0 = vmul.f32 %v1641_v62, %v1296_v42 }
 0x67f   :  { %v1433_v1 = vmax.f32 %v1369_v58, 0.0  ;;  %v1434_v2 = vmax.f32 %v1370_v60, 0.0  ;;  %v1439_v3 = vmax.f32 %v1375_v61, 0.0 }
 0x680   :  { %v1440_v46 = vmax.f32 %v1376_v0, 0.0  ;;  %v1289_v21 = vpop.permute.xlu1 %1288  ;;  %v1307_v5 = vpop.permute.xlu0 %1306 }
 0x681   :  { %1497 = vst [vmem:[#allocation5 + $0x170] sm:$0xff] %v1433_v1  ;;  %1498 = vst [vmem:[#allocation5 + $0x178] sm:$0xff] %v1434_v2  ;;  %v1373_v10 = vmul.f32 %v1642_v6, %v1289_v21  ;;  %v1374_v4 = vmul.f32 %v1643_v13, %v1289_v21  ;;  %v1379_v39 = vmul.f32 %v1644_v7, %v1307_v5 }
 0x682   :  { %1503 = vst [vmem:[#allocation5 + $0x1a0] sm:$0xff] %v1439_v3  ;;  %1504 = vst [vmem:[#allocation5 + $0x1a8] sm:$0xff] %v1440_v46  ;;  %v1380_v49 = vmul.f32 %v1645_v12, %v1307_v5 }
 0x683   :  { %v1437_v48 = vmax.f32 %v1373_v10, 0.0  ;;  %v1438_v8 = vmax.f32 %v1374_v4, 0.0  ;;  %v1443_v14 = vmax.f32 %v1379_v39, 0.0 }
 0x684   :  { %v1444_v15 = vmax.f32 %v1380_v49, 0.0  ;;  %v1300_v16 = vpop.permute.xlu1 %1299  ;;  %v1318_v9 = vpop.permute.xlu0 %1317 }
 0x685   :  { %1501 = vst [vmem:[#allocation5 + $0x190] sm:$0xff] %v1437_v48  ;;  %1502 = vst [vmem:[#allocation5 + $0x198] sm:$0xff] %v1438_v8  ;;  %v1377_v22 = vmul.f32 %v1646_v52, %v1300_v16  ;;  %v1378_v24 = vmul.f32 %v1647_v23, %v1300_v16  ;;  %v1383_v30 = vmul.f32 %v1648_v29, %v1318_v9 }
 0x686   :  { %1507 = vst [vmem:[#allocation5 + $0x1c0] sm:$0xff] %v1443_v14  ;;  %1508 = vst [vmem:[#allocation5 + $0x1c8] sm:$0xff] %v1444_v15  ;;  %v1384_v32 = vmul.f32 %v1649_v31, %v1318_v9 }
 0x687   :  { %v1441_v35 = vmax.f32 %v1377_v22, 0.0  ;;  %v1442_v36 = vmax.f32 %v1378_v24, 0.0  ;;  %v1447_v37 = vmax.f32 %v1383_v30, 0.0 }
 0x688   :  { %v1448_v38 = vmax.f32 %v1384_v32, 0.0  ;;  %v1311_v17 = vpop.permute.xlu1 %1310 }
 0x689   :  { %1505 = vst [vmem:[#allocation5 + $0x1b0] sm:$0xff] %v1441_v35  ;;  %1506 = vst [vmem:[#allocation5 + $0x1b8] sm:$0xff] %v1442_v36  ;;  %v1381_v25 = vmul.f32 %v1650_v18, %v1311_v17  ;;  %v1382_v26 = vmul.f32 %v1651_v40, %v1311_v17 }
 0x68a   :  { %1511 = vst [vmem:[#allocation5 + $0x1e0] sm:$0xff] %v1447_v37  ;;  %1512 = vst [vmem:[#allocation5 + $0x1e8] sm:$0xff] %v1448_v38 }
 0x68b   :  { %v1445_v11 = vmax.f32 %v1381_v25, 0.0  ;;  %v1446_v41 = vmax.f32 %v1382_v26, 0.0 }
 0x68c   :  { %v1322_v43 = vpop.permute.xlu1 %1321 }
 0x68d   :  { %1509 = vst [vmem:[#allocation5 + $0x1d0] sm:$0xff] %v1445_v11  ;;  %1510 = vst [vmem:[#allocation5 + $0x1d8] sm:$0xff] %v1446_v41  ;;  %v1385_v44 = vmul.f32 %v1652_v19, %v1322_v43  ;;  %v1386_v33 = vmul.f32 %v1653_v20, %v1322_v43 }
 0x68f   :  { %v1449_v34 = vmax.f32 %v1385_v44, 0.0  ;;  %v1450_v45 = vmax.f32 %v1386_v33, 0.0 }
 0x691   :  { %1513 = vst [vmem:[#allocation5 + $0x1f0] sm:$0xff] %v1449_v34  ;;  %1514 = vst [vmem:[#allocation5 + $0x1f8] sm:$0xff] %v1450_v45 }
 0x692   :  { %1687 = shalt.err (!%p1684_p12)
}
 0x693   :  { %s1688_s17 = scalar_lea.hbm %s2191_s5, 8192 }
 0x694   :  { %p1689_p13 = scmp.ne.s32.totalorder %s2191_s5, %s1688_s17  ;;  %p1692_p0 = scmp.lt.u32.totalorder %s1688_s17, %s2191_s5 }
 0x696   :  { %p1694_p1 = pnand %p1692_p0, %p1689_p13 }
 0x698   :  { %1697 = shalt.err (!%p1694_p1)
}
 0x699   :  { %1526 = dma.vmem_to_hbm [thread:$0]  %s1521_s4, 8192, %s2191_s5, [#allocation4], %s1703_s28, %s1703_s28, %s1704_s29  }
 0x69a   :  { %1700 = dma.done.wait [#allocation4], 8192  }
 0x69b   :  { %1701 = vsyncadd [#allocation4], 4294959104 }
 0x69c   :  { %1530 = vsyncpa [#allocation3], 1 }
 0x69d   :  { %1531 = vsyncpa [#allocation4], 1 }

</bundles_post_ra>
